<compile_context>
chip_gen: v7x
topology: tpu7x:2x2x1
jax: 0.10.0
libtpu: 0.0.40
codegen_flags: <defaults>
</compile_context>

<pallas_src>
import functools

import jax
import jax.numpy as jnp
from jax.experimental import pallas as pl
from jax.experimental.pallas import tpu as pltpu

F32 = jnp.float32


def _col_normalize(w, eps=1e-12):
    """F.normalize(w, dim=0): column-wise L2 normalisation (hoisted out of the kernel)."""
    return w / jnp.maximum(jnp.sqrt(jnp.sum(w * w, axis=0, keepdims=True)), eps)


# ----------------------------------------------------------------------------------
# The single fused kernel: one grid step == one sequence of the batch.
# ----------------------------------------------------------------------------------
def _fused_forward_kernel(emb_ref, auxb_ref, msa_ref,
                          lin_w, lin_b, lc_wh,
                          cnn1_w, cnn1_b, lstm2_w, lstm2_b,
                          fcn1_w, fcn1_b, fcn2f_w, fcn2f_b,
                          msa_w, msa_b, msa_nw,
                          w4p_ref, fcn4_wm, fcn4_b, fcn5_nw,
                          model_ref, cs_ref):
    eps = 1e-12
    hm = cnn1_w.shape[0]        # h_mid
    e3 = w4p_ref.shape[0]       # attention value width (ef3)

    x = emb_ref[...]            # [L, emb_size]  (one full sequence)

    # embedding-linear + ReLU                    (emb_size -> input_dim-4)
    t = jnp.maximum(jnp.dot(x, lin_w[...], preferred_element_type=F32) + lin_b[...], 0.0)

    # lan + cnn first stage fused along N (cols [:hm] = lan, [hm:] = cnn).
    # The aux contribution (aux @ lc_wa + lc_b) was hoisted to XLA as a per-sequence bias.
    z = jnp.dot(t, lc_wh[...], preferred_element_type=F32) + auxb_ref[...]
    h1 = jnp.tanh(z[:, :hm])                                             # lstm_lan surrogate
    h2 = jnp.maximum(z[:, hm:], 0.0)                                     # cnn surrogate
    h2 = jnp.maximum(jnp.dot(h2, cnn1_w[...], preferred_element_type=F32)
                     + cnn1_b[...], 0.0)                                 # cnn1 surrogate
    h = jnp.tanh(jnp.dot(h1 + h2, lstm2_w[...], preferred_element_type=F32)
                 + lstm2_b[...])                                         # lstm2 surrogate [L, e1]

    # fcn1 -> (fcn2 folded with fcn2_) in one wider matmul; split i2 / cs in-register.
    i1 = jnp.tanh(jnp.dot(h, fcn1_w[...], preferred_element_type=F32) + fcn1_b[...])
    z2 = jnp.dot(i1, fcn2f_w[...], preferred_element_type=F32) + fcn2f_b[...]  # [L, e3+csef]
    i2 = z2[:, :e3]                                                      # [L, e3]
    cs_ref[...] = z2[:, e3:].astype(cs_ref.dtype)                        # [L, csef]

    # attention pooling over the sequence axis: softmax over L per channel of h.
    m = jnp.max(h, axis=0, keepdims=True)
    ex = jnp.exp(h - m)
    denom = jnp.sum(ex, axis=0, keepdims=True)
    p = ex / denom              # exact divide; pl.reciprocal(denom, approx=True) if EUP-bound

    # pooledT[k, c] = sum_l i2[l, k] * p[l, c]   (== pooled[c, k] transposed)
    pooledT = jax.lax.dot_general(i2, p, (((0,), (0,)), ((), ())),
                                  preferred_element_type=F32)            # [e3, e1]

    # fcn_embedding_msa: Linear -> NormedLinear (weight pre-normalised outside)
    msa = jnp.dot(msa_ref[...], msa_w[...], preferred_element_type=F32) + msa_b[...]   # [1, e5]
    msa = msa / jnp.maximum(jnp.sqrt(jnp.sum(msa * msa, axis=1, keepdims=True)), eps)
    msa = jnp.dot(msa, msa_nw[...], preferred_element_type=F32)                         # [1, e6]

    # fcn4: pooled part accumulated per attention column k against the pre-arranged
    # (e3, e1, e4) weight -> no in-kernel flatten of pooled; msa part is a 2nd matmul.
    acc = jnp.dot(msa, fcn4_wm[...], preferred_element_type=F32) + fcn4_b[...]          # [1, e4]
    for k in range(e3):
        acc = acc + jnp.dot(pooledT[k:k + 1, :], w4p_ref[k], preferred_element_type=F32)
    out = jnp.maximum(acc, 0.0)

    # fcn5 (NormedLinear, weight pre-normalised outside)
    out = out / jnp.maximum(jnp.sqrt(jnp.sum(out * out, axis=1, keepdims=True)), eps)
    model_ref[...] = jnp.dot(out, fcn5_nw[...], preferred_element_type=F32).astype(model_ref.dtype)


def fused_forward_pallas(emb, aux_bias3, msa_emb3, weights, csef, n_out):
    """emb: [B, L, E]; aux_bias3: [B, 1, 2*h_mid]; msa_emb3: [B, 1, emb_msa]."""
    B, L, E = emb.shape

    def per_batch(trailing):                      # one sequence/row per grid step
        return pl.BlockSpec((None,) + trailing, lambda b: (b, 0, 0))

    def resident(arr):                            # weights DMA'd once, VMEM-resident
        nd = arr.ndim
        return pl.BlockSpec(arr.shape, lambda b, nd=nd: (0,) * nd)

    out_shape = (jax.ShapeDtypeStruct((B, 1, n_out), F32),
                 jax.ShapeDtypeStruct((B, L, csef), F32))

    model3, cs = pl.pallas_call(
        _fused_forward_kernel,
        out_shape=out_shape,
        grid=(B,),
        in_specs=[per_batch((L, E)),
                  per_batch((1, aux_bias3.shape[-1])),
                  per_batch((1, msa_emb3.shape[-1]))] + [resident(w) for w in weights],
        out_specs=(per_batch((1, n_out)), per_batch((L, csef))),
        compiler_params=pltpu.CompilerParams(dimension_semantics=("parallel",)),
    )(emb, aux_bias3, msa_emb3, *weights)
    return model3[:, 0, :], cs


# ----------------------------------------------------------------------------------
# Parameters (deterministic, synthetic) + forward
# ----------------------------------------------------------------------------------
def init_params(key, cfg):
    def nrm(k, shape, scale=0.1):
        return (scale * jax.random.normal(k, shape)).astype(F32)

    ks = iter(jax.random.split(key, 32))
    idm, hm = cfg["input_dim"], cfg["h_mid"]
    idm4 = idm - 4
    e1, e2, e3 = cfg["ef1"], cfg["ef2"], cfg["ef3"]
    e4, e5, e6 = cfg["ef4"], cfg["ef5"], cfg["ef6"]
    p = {
        "emb": nrm(next(ks), (cfg["vocab"], cfg["emb_size"]), 1.0),
        "lin_w": nrm(next(ks), (cfg["emb_size"], idm4)),
        "lin_b": jnp.zeros((1, idm4), F32),
        # TODO(synk): LSTM_attention / TextCNN / TextCNN / BLSTM definitions are not in the
        # provided source; the stages below are shape-preserving per-token surrogates.
        # First stage fused along N (cols [:hm] = lstm_lan surrogate, [hm:] = cnn surrogate)
        # and split along K into token / aux row blocks.
        "lc_wh": nrm(next(ks), (idm4, 2 * hm)),
        "lc_wa": nrm(next(ks), (4, 2 * hm)),
        "lc_b": jnp.zeros((1, 2 * hm), F32),
        "cnn1_w": nrm(next(ks), (hm, hm)),
        "cnn1_b": jnp.zeros((1, hm), F32),
        "lstm2_w": nrm(next(ks), (hm, e1)),
        "lstm2_b": jnp.zeros((1, e1), F32),
        "fcn1_w": nrm(next(ks), (e1, e2)),
        "fcn1_b": jnp.zeros((1, e2), F32),
        "fcn2_w": nrm(next(ks), (e2, e3)),
        "fcn2_b": jnp.zeros((1, e3), F32),
        "fcn2__w": nrm(next(ks), (e3, cfg["csef"])),
        "fcn2__b": jnp.zeros((1, cfg["csef"]), F32),
        "msa_w": nrm(next(ks), (cfg["emb_msa"], e5)),
        "msa_b": jnp.zeros((1, e5), F32),
        "msa_norm_w": nrm(next(ks), (e5, e6), 1.0),
        # fcn4 weight split by input block (pooled-attention features / msa features);
        # the pooled block uses PyTorch's row-major (c, k) flatten convention.
        "fcn4_w_pool": nrm(next(ks), (e1 * e3, e4)),
        "fcn4_w_msa": nrm(next(ks), (e6, e4)),
        "fcn4_b": jnp.zeros((1, e4), F32),
        "fcn5_w": nrm(next(ks), (e4, cfg["n_out"]), 1.0),
    }
    return p


def attention_crf_forward(params, x, cfg):
    L = cfg["max_len"]
    e1, e3, e4 = cfg["ef1"], cfg["ef3"], cfg["ef4"]

    x = x.astype(F32)
    aux = x[:, L:L + 4]                        # [B, 4]
    msa_emb = x[:, L + 4:]                     # [B, emb_msa]
    tokens = x[:, :L].astype(jnp.int32)        # [B, L]   (matches .long())

    # embedding lookup (gather) -- glue, not a kernel hot path
    emb = jnp.take(params["emb"], tokens, axis=0)                        # [B, L, emb_size]

    # --- weight / bias prep hoisted out of the kernel (tiny, constant per forward) ---
    # aux contribution as a per-sequence bias (aux is constant across L for a batch row)
    aux_bias = aux @ params["lc_wa"] + params["lc_b"]                    # [B, 2*h_mid]
    # fold fcn2_ into fcn2 (no nonlinearity in between)
    w2, b2 = params["fcn2_w"], params["fcn2_b"]
    w2_, b2_ = params["fcn2__w"], params["fcn2__b"]
    fcn2f_w = jnp.concatenate([w2, w2 @ w2_], axis=1)                    # (e2, e3+csef)
    fcn2f_b = jnp.concatenate([b2, b2 @ w2_ + b2_], axis=1)              # (1, e3+csef)
    # NormedLinear weight column-normalisation
    msa_nw = _col_normalize(params["msa_norm_w"])
    fcn5_nw = _col_normalize(params["fcn5_w"])
    # fcn4 pooled-block weight rearranged (e1*e3, e4) -> (e3, e1, e4)
    w4p_k = params["fcn4_w_pool"].reshape(e1, e3, e4).transpose(1, 0, 2)

    weights = [params["lin_w"], params["lin_b"], params["lc_wh"],
               params["cnn1_w"], params["cnn1_b"],
               params["lstm2_w"], params["lstm2_b"],
               params["fcn1_w"], params["fcn1_b"],
               fcn2f_w, fcn2f_b,
               params["msa_w"], params["msa_b"], msa_nw,
               w4p_k, params["fcn4_w_msa"], params["fcn4_b"], fcn5_nw]

    model, cs = fused_forward_pallas(emb, aux_bias[:, None, :], msa_emb[:, None, :],
                                     weights, cfg["csef"], cfg["n_out"])
    return model, cs


# ----------------------------------------------------------------------------------
# Pure-JAX reference (f32, highest precision) for a correctness check
# ----------------------------------------------------------------------------------
def _reference_forward(params, x, cfg):
    hp = jax.lax.Precision.HIGHEST
    dot = functools.partial(jnp.dot, precision=hp)
    B = x.shape[0]
    L, e1, e3, hm = cfg["max_len"], cfg["ef1"], cfg["ef3"], cfg["h_mid"]
    x = x.astype(F32)
    aux = x[:, L:L + 4]
    msa_emb = x[:, L + 4:]
    tokens = x[:, :L].astype(jnp.int32)
    emb = jnp.take(params["emb"], tokens, axis=0).reshape(B * L, cfg["emb_size"])
    aux_rows = jnp.broadcast_to(aux[:, None, :], (B, L, 4)).reshape(B * L, 4)

    t = jnp.maximum(dot(emb, params["lin_w"]) + params["lin_b"], 0.0)
    z = dot(t, params["lc_wh"]) + dot(aux_rows, params["lc_wa"]) + params["lc_b"]
    h1 = jnp.tanh(z[:, :hm])
    h2 = jnp.maximum(z[:, hm:], 0.0)
    h2 = jnp.maximum(dot(h2, params["cnn1_w"]) + params["cnn1_b"], 0.0)
    h = jnp.tanh(dot(h1 + h2, params["lstm2_w"]) + params["lstm2_b"])
    i2 = jnp.tanh(dot(h, params["fcn1_w"]) + params["fcn1_b"])
    i2 = dot(i2, params["fcn2_w"]) + params["fcn2_b"]
    cs = dot(i2, params["fcn2__w"]) + params["fcn2__b"]
    cs_model = cs.reshape(B, L, cfg["csef"])

    H = h.reshape(B, L, e1)
    A = i2.reshape(B, L, e3)
    p = jax.nn.softmax(H, axis=1)
    pooled = jnp.einsum('blc,blk->bck', p, A, precision=hp).reshape(B, e1 * e3)

    msa = dot(msa_emb, params["msa_w"]) + params["msa_b"]
    msa = msa / jnp.maximum(jnp.linalg.norm(msa, axis=1, keepdims=True), 1e-12)
    msa = dot(msa, _col_normalize(params["msa_norm_w"]))
    out = jnp.maximum(dot(pooled, params["fcn4_w_pool"])
                      + dot(msa, params["fcn4_w_msa"]) + params["fcn4_b"], 0.0)
    out = out / jnp.maximum(jnp.linalg.norm(out, axis=1, keepdims=True), 1e-12)
    model = dot(out, _col_normalize(params["fcn5_w"]))
    return model, cs_model


# ----------------------------------------------------------------------------------
if __name__ == "__main__":
    cfg = dict(
        max_len=16,     # scaled-down stand-in for max_text_len (=70 in the original)
        vocab=32,
        emb_size=16,
        input_dim=16,   # linear: emb_size -> input_dim-4, then 4 aux features folded in
        h_mid=32,
        ef1=32, ef2=16, ef3=8, csef=11, ef4=32, ef5=16, ef6=8,
        emb_msa=32,     # scaled-down stand-in for embedding_feature_dim_msa (=768)
        n_out=6,
    )
    B = 4
    key = jax.random.PRNGKey(0)
    k_tok, k_aux, k_emb, k_par = jax.random.split(key, 4)
    tokens = jax.random.randint(k_tok, (B, cfg["max_len"]), 0, cfg["vocab"]).astype(F32)
    aux = jax.random.normal(k_aux, (B, 4), F32)
    msa_emb = jax.random.normal(k_emb, (B, cfg["emb_msa"]), F32)
    x = jnp.concatenate([tokens, aux, msa_emb], axis=1)          # [B, 16+4+32] = [4, 52]

    params = init_params(k_par, cfg)

    fwd = jax.jit(functools.partial(attention_crf_forward, cfg=cfg))
    model_out, cs_out = fwd(params, x)
    jax.block_until_ready((model_out, cs_out))

    assert model_out.shape == (B, cfg["n_out"])
    assert cs_out.shape == (B, cfg["max_len"], cfg["csef"])
    assert bool(jnp.all(jnp.isfinite(model_out))) and bool(jnp.all(jnp.isfinite(cs_out)))

    # correctness vs. pure-JAX reference
    ref_model, ref_cs = _reference_forward(params, x, cfg)
    assert jnp.allclose(model_out, ref_model, atol=5e-3, rtol=5e-3)
    assert jnp.allclose(cs_out, ref_cs, atol=5e-3, rtol=5e-3)

    print("KERNEL_OK")
</pallas_src>

<mosaic_0001>
module attributes {stable_mosaic.version = 11 : i64} {
  func.func @_fused_forward_kernel(%arg0: i32, %arg1: memref<1x16x16xf32, #tpu.memory_space<vmem>>, %arg2: memref<1x1x64xf32, #tpu.memory_space<vmem>>, %arg3: memref<1x1x32xf32, #tpu.memory_space<vmem>>, %arg4: memref<16x12xf32, #tpu.memory_space<vmem>>, %arg5: memref<1x12xf32, #tpu.memory_space<vmem>>, %arg6: memref<12x64xf32, #tpu.memory_space<vmem>>, %arg7: memref<32x32xf32, #tpu.memory_space<vmem>>, %arg8: memref<1x32xf32, #tpu.memory_space<vmem>>, %arg9: memref<32x32xf32, #tpu.memory_space<vmem>>, %arg10: memref<1x32xf32, #tpu.memory_space<vmem>>, %arg11: memref<32x16xf32, #tpu.memory_space<vmem>>, %arg12: memref<1x16xf32, #tpu.memory_space<vmem>>, %arg13: memref<16x19xf32, #tpu.memory_space<vmem>>, %arg14: memref<1x19xf32, #tpu.memory_space<vmem>>, %arg15: memref<32x16xf32, #tpu.memory_space<vmem>>, %arg16: memref<1x16xf32, #tpu.memory_space<vmem>>, %arg17: memref<16x8xf32, #tpu.memory_space<vmem>>, %arg18: memref<8x32x32xf32, #tpu.memory_space<vmem>>, %arg19: memref<8x32xf32, #tpu.memory_space<vmem>>, %arg20: memref<1x32xf32, #tpu.memory_space<vmem>>, %arg21: memref<32x6xf32, #tpu.memory_space<vmem>>, %arg22: memref<1x1x6xf32, #tpu.memory_space<vmem>>, %arg23: memref<1x16x11xf32, #tpu.memory_space<vmem>>) attributes {dimension_semantics = [#tpu.dimension_semantics<parallel>], iteration_bounds = array<i64: 4>, scalar_prefetch = 0 : i64, scratch_operands = 0 : i64, tpu.core_type = #tpu.core_type<tc>, window_params = [{transform_indices = @transform_0, window_bounds = array<i64: 1, 16, 16>}, {transform_indices = @transform_1, window_bounds = array<i64: 1, 1, 64>}, {transform_indices = @transform_2, window_bounds = array<i64: 1, 1, 32>}, {pipeline_mode = #tpu.pipeline_mode<synchronous>, transform_indices = @transform_3, window_bounds = array<i64: 16, 12>}, {pipeline_mode = #tpu.pipeline_mode<synchronous>, transform_indices = @transform_4, window_bounds = array<i64: 1, 12>}, {pipeline_mode = #tpu.pipeline_mode<synchronous>, transform_indices = @transform_5, window_bounds = array<i64: 12, 64>}, {pipeline_mode = #tpu.pipeline_mode<synchronous>, transform_indices = @transform_6, window_bounds = array<i64: 32, 32>}, {pipeline_mode = #tpu.pipeline_mode<synchronous>, transform_indices = @transform_7, window_bounds = array<i64: 1, 32>}, {pipeline_mode = #tpu.pipeline_mode<synchronous>, transform_indices = @transform_8, window_bounds = array<i64: 32, 32>}, {pipeline_mode = #tpu.pipeline_mode<synchronous>, transform_indices = @transform_9, window_bounds = array<i64: 1, 32>}, {pipeline_mode = #tpu.pipeline_mode<synchronous>, transform_indices = @transform_10, window_bounds = array<i64: 32, 16>}, {pipeline_mode = #tpu.pipeline_mode<synchronous>, transform_indices = @transform_11, window_bounds = array<i64: 1, 16>}, {pipeline_mode = #tpu.pipeline_mode<synchronous>, transform_indices = @transform_12, window_bounds = array<i64: 16, 19>}, {pipeline_mode = #tpu.pipeline_mode<synchronous>, transform_indices = @transform_13, window_bounds = array<i64: 1, 19>}, {pipeline_mode = #tpu.pipeline_mode<synchronous>, transform_indices = @transform_14, window_bounds = array<i64: 32, 16>}, {pipeline_mode = #tpu.pipeline_mode<synchronous>, transform_indices = @transform_15, window_bounds = array<i64: 1, 16>}, {pipeline_mode = #tpu.pipeline_mode<synchronous>, transform_indices = @transform_16, window_bounds = array<i64: 16, 8>}, {pipeline_mode = #tpu.pipeline_mode<synchronous>, transform_indices = @transform_17, window_bounds = array<i64: 8, 32, 32>}, {pipeline_mode = #tpu.pipeline_mode<synchronous>, transform_indices = @transform_18, window_bounds = array<i64: 8, 32>}, {pipeline_mode = #tpu.pipeline_mode<synchronous>, transform_indices = @transform_19, window_bounds = array<i64: 1, 32>}, {pipeline_mode = #tpu.pipeline_mode<synchronous>, transform_indices = @transform_20, window_bounds = array<i64: 32, 6>}, {transform_indices = @transform_21, window_bounds = array<i64: 1, 1, 6>}, {transform_indices = @transform_22, window_bounds = array<i64: 1, 16, 11>}]} {
    %c0 = arith.constant 0 : index
    %c0_0 = arith.constant 0 : index
    %c0_1 = arith.constant 0 : index
    %0 = vector.load %arg1[%c0, %c0_0, %c0_1] : memref<1x16x16xf32, #tpu.memory_space<vmem>>, vector<1x16x16xf32>
    %1 = vector.shape_cast %0 : vector<1x16x16xf32> to vector<16x16xf32>
    %c0_2 = arith.constant 0 : index
    %c0_3 = arith.constant 0 : index
    %2 = vector.load %arg4[%c0_2, %c0_3] : memref<16x12xf32, #tpu.memory_space<vmem>>, vector<16x12xf32>
    %cst = arith.constant dense<0.000000e+00> : vector<16x12xf32>
    %3 = tpu.matmul %1, %2, %cst {dimension_numbers = #tpu.dot_dimension_numbers<[1], [0], [0], [1], [0, 0, 1, 1], [], []>} : vector<16x16xf32>, vector<16x12xf32>, vector<16x12xf32> -> vector<16x12xf32>
    %c0_4 = arith.constant 0 : index
    %c0_5 = arith.constant 0 : index
    %4 = vector.load %arg5[%c0_4, %c0_5] : memref<1x12xf32, #tpu.memory_space<vmem>>, vector<1x12xf32>
    %5 = vector.broadcast %4 : vector<1x12xf32> to vector<16x12xf32>
    %6 = arith.addf %3, %5 : vector<16x12xf32>
    %cst_6 = arith.constant 0.000000e+00 : f32
    %7 = vector.broadcast %cst_6 : f32 to vector<16x12xf32>
    %8 = arith.maximumf %6, %7 : vector<16x12xf32>
    %c0_7 = arith.constant 0 : index
    %c0_8 = arith.constant 0 : index
    %9 = vector.load %arg6[%c0_7, %c0_8] : memref<12x64xf32, #tpu.memory_space<vmem>>, vector<12x64xf32>
    %cst_9 = arith.constant dense<0.000000e+00> : vector<16x64xf32>
    %10 = tpu.matmul %8, %9, %cst_9 {dimension_numbers = #tpu.dot_dimension_numbers<[1], [0], [0], [1], [0, 0, 1, 1], [], []>} : vector<16x12xf32>, vector<12x64xf32>, vector<16x64xf32> -> vector<16x64xf32>
    %c0_10 = arith.constant 0 : index
    %c0_11 = arith.constant 0 : index
    %c0_12 = arith.constant 0 : index
    %11 = vector.load %arg2[%c0_10, %c0_11, %c0_12] : memref<1x1x64xf32, #tpu.memory_space<vmem>>, vector<1x1x64xf32>
    %12 = vector.shape_cast %11 : vector<1x1x64xf32> to vector<1x64xf32>
    %13 = vector.broadcast %12 : vector<1x64xf32> to vector<16x64xf32>
    %14 = arith.addf %10, %13 : vector<16x64xf32>
    %15 = vector.extract_strided_slice %14 {offsets = [0, 0], sizes = [16, 32], strides = [1, 1]} : vector<16x64xf32> to vector<16x32xf32>
    %16 = math.tanh %15 : vector<16x32xf32>
    %17 = vector.extract_strided_slice %14 {offsets = [0, 32], sizes = [16, 32], strides = [1, 1]} : vector<16x64xf32> to vector<16x32xf32>
    %cst_13 = arith.constant 0.000000e+00 : f32
    %18 = vector.broadcast %cst_13 : f32 to vector<16x32xf32>
    %19 = arith.maximumf %17, %18 : vector<16x32xf32>
    %c0_14 = arith.constant 0 : index
    %c0_15 = arith.constant 0 : index
    %20 = vector.load %arg7[%c0_14, %c0_15] : memref<32x32xf32, #tpu.memory_space<vmem>>, vector<32x32xf32>
    %cst_16 = arith.constant dense<0.000000e+00> : vector<16x32xf32>
    %21 = tpu.matmul %19, %20, %cst_16 {dimension_numbers = #tpu.dot_dimension_numbers<[1], [0], [0], [1], [0, 0, 1, 1], [], []>} : vector<16x32xf32>, vector<32x32xf32>, vector<16x32xf32> -> vector<16x32xf32>
    %c0_17 = arith.constant 0 : index
    %c0_18 = arith.constant 0 : index
    %22 = vector.load %arg8[%c0_17, %c0_18] : memref<1x32xf32, #tpu.memory_space<vmem>>, vector<1x32xf32>
    %23 = vector.broadcast %22 : vector<1x32xf32> to vector<16x32xf32>
    %24 = arith.addf %21, %23 : vector<16x32xf32>
    %cst_19 = arith.constant 0.000000e+00 : f32
    %25 = vector.broadcast %cst_19 : f32 to vector<16x32xf32>
    %26 = arith.maximumf %24, %25 : vector<16x32xf32>
    %27 = arith.addf %16, %26 : vector<16x32xf32>
    %c0_20 = arith.constant 0 : index
    %c0_21 = arith.constant 0 : index
    %28 = vector.load %arg9[%c0_20, %c0_21] : memref<32x32xf32, #tpu.memory_space<vmem>>, vector<32x32xf32>
    %cst_22 = arith.constant dense<0.000000e+00> : vector<16x32xf32>
    %29 = tpu.matmul %27, %28, %cst_22 {dimension_numbers = #tpu.dot_dimension_numbers<[1], [0], [0], [1], [0, 0, 1, 1], [], []>} : vector<16x32xf32>, vector<32x32xf32>, vector<16x32xf32> -> vector<16x32xf32>
    %c0_23 = arith.constant 0 : index
    %c0_24 = arith.constant 0 : index
    %30 = vector.load %arg10[%c0_23, %c0_24] : memref<1x32xf32, #tpu.memory_space<vmem>>, vector<1x32xf32>
    %31 = vector.broadcast %30 : vector<1x32xf32> to vector<16x32xf32>
    %32 = arith.addf %29, %31 : vector<16x32xf32>
    %33 = math.tanh %32 : vector<16x32xf32>
    %c0_25 = arith.constant 0 : index
    %c0_26 = arith.constant 0 : index
    %34 = vector.load %arg11[%c0_25, %c0_26] : memref<32x16xf32, #tpu.memory_space<vmem>>, vector<32x16xf32>
    %cst_27 = arith.constant dense<0.000000e+00> : vector<16x16xf32>
    %35 = tpu.matmul %33, %34, %cst_27 {dimension_numbers = #tpu.dot_dimension_numbers<[1], [0], [0], [1], [0, 0, 1, 1], [], []>} : vector<16x32xf32>, vector<32x16xf32>, vector<16x16xf32> -> vector<16x16xf32>
    %c0_28 = arith.constant 0 : index
    %c0_29 = arith.constant 0 : index
    %36 = vector.load %arg12[%c0_28, %c0_29] : memref<1x16xf32, #tpu.memory_space<vmem>>, vector<1x16xf32>
    %37 = vector.broadcast %36 : vector<1x16xf32> to vector<16x16xf32>
    %38 = arith.addf %35, %37 : vector<16x16xf32>
    %39 = math.tanh %38 : vector<16x16xf32>
    %c0_30 = arith.constant 0 : index
    %c0_31 = arith.constant 0 : index
    %40 = vector.load %arg13[%c0_30, %c0_31] : memref<16x19xf32, #tpu.memory_space<vmem>>, vector<16x19xf32>
    %cst_32 = arith.constant dense<0.000000e+00> : vector<16x19xf32>
    %41 = tpu.matmul %39, %40, %cst_32 {dimension_numbers = #tpu.dot_dimension_numbers<[1], [0], [0], [1], [0, 0, 1, 1], [], []>} : vector<16x16xf32>, vector<16x19xf32>, vector<16x19xf32> -> vector<16x19xf32>
    %c0_33 = arith.constant 0 : index
    %c0_34 = arith.constant 0 : index
    %42 = vector.load %arg14[%c0_33, %c0_34] : memref<1x19xf32, #tpu.memory_space<vmem>>, vector<1x19xf32>
    %43 = vector.broadcast %42 : vector<1x19xf32> to vector<16x19xf32>
    %44 = arith.addf %41, %43 : vector<16x19xf32>
    %45 = vector.extract_strided_slice %44 {offsets = [0, 0], sizes = [16, 8], strides = [1, 1]} : vector<16x19xf32> to vector<16x8xf32>
    %46 = vector.extract_strided_slice %44 {offsets = [0, 8], sizes = [16, 11], strides = [1, 1]} : vector<16x19xf32> to vector<16x11xf32>
    %c0_35 = arith.constant 0 : index
    %c0_36 = arith.constant 0 : index
    %c0_37 = arith.constant 0 : index
    %47 = vector.load %arg23[%c0_35, %c0_36, %c0_37] : memref<1x16x11xf32, #tpu.memory_space<vmem>>, vector<1x16x11xf32>
    %48 = vector.shape_cast %47 : vector<1x16x11xf32> to vector<16x11xf32>
    %49 = vector.shape_cast %46 : vector<16x11xf32> to vector<1x16x11xf32>
    tpu.vector_store %arg23[%c0_35, %c0_36, %c0_37], %49 {strides = array<i32>} : memref<1x16x11xf32, #tpu.memory_space<vmem>>, vector<1x16x11xf32>,
    %cst_38 = arith.constant dense<0xFF800000> : vector<32xf32>
    %50 = vector.multi_reduction <maximumf>, %33, %cst_38 [0] : vector<16x32xf32> to vector<32xf32>
    %51 = vector.shape_cast %50 : vector<32xf32> to vector<1x32xf32>
    %52 = vector.broadcast %51 : vector<1x32xf32> to vector<16x32xf32>
    %53 = arith.subf %33, %52 : vector<16x32xf32>
    %54 = math.exp %53 : vector<16x32xf32>
    %cst_39 = arith.constant dense<0.000000e+00> : vector<32xf32>
    %55 = vector.multi_reduction <add>, %54, %cst_39 [0] : vector<16x32xf32> to vector<32xf32>
    %56 = vector.shape_cast %55 : vector<32xf32> to vector<1x32xf32>
    %57 = vector.broadcast %56 : vector<1x32xf32> to vector<16x32xf32>
    %58 = arith.divf %54, %57 : vector<16x32xf32>
    %cst_40 = arith.constant dense<0.000000e+00> : vector<8x32xf32>
    %59 = tpu.matmul %45, %58, %cst_40 {dimension_numbers = #tpu.dot_dimension_numbers<[0], [0], [1], [1], [0, 1, 1, 1], [], []>} : vector<16x8xf32>, vector<16x32xf32>, vector<8x32xf32> -> vector<8x32xf32>
    %c0_41 = arith.constant 0 : index
    %c0_42 = arith.constant 0 : index
    %c0_43 = arith.constant 0 : index
    %60 = vector.load %arg3[%c0_41, %c0_42, %c0_43] : memref<1x1x32xf32, #tpu.memory_space<vmem>>, vector<1x1x32xf32>
    %61 = vector.shape_cast %60 : vector<1x1x32xf32> to vector<1x32xf32>
    %c0_44 = arith.constant 0 : index
    %c0_45 = arith.constant 0 : index
    %62 = vector.load %arg15[%c0_44, %c0_45] : memref<32x16xf32, #tpu.memory_space<vmem>>, vector<32x16xf32>
    %cst_46 = arith.constant dense<0.000000e+00> : vector<1x16xf32>
    %63 = tpu.matmul %61, %62, %cst_46 {dimension_numbers = #tpu.dot_dimension_numbers<[1], [0], [0], [1], [0, 0, 1, 1], [], []>} : vector<1x32xf32>, vector<32x16xf32>, vector<1x16xf32> -> vector<1x16xf32>
    %c0_47 = arith.constant 0 : index
    %c0_48 = arith.constant 0 : index
    %64 = vector.load %arg16[%c0_47, %c0_48] : memref<1x16xf32, #tpu.memory_space<vmem>>, vector<1x16xf32>
    %65 = arith.addf %63, %64 : vector<1x16xf32>
    %66 = arith.mulf %65, %65 : vector<1x16xf32>
    %cst_49 = arith.constant dense<0.000000e+00> : vector<1xf32>
    %67 = vector.multi_reduction <add>, %66, %cst_49 [1] : vector<1x16xf32> to vector<1xf32>
    %68 = vector.shape_cast %67 : vector<1xf32> to vector<1x1xf32>
    %69 = math.sqrt %68 : vector<1x1xf32>
    %cst_50 = arith.constant 9.99999996E-13 : f32
    %70 = vector.broadcast %cst_50 : f32 to vector<1x1xf32>
    %71 = arith.maximumf %69, %70 : vector<1x1xf32>
    %72 = vector.broadcast %71 : vector<1x1xf32> to vector<1x16xf32>
    %73 = arith.divf %65, %72 : vector<1x16xf32>
    %c0_51 = arith.constant 0 : index
    %c0_52 = arith.constant 0 : index
    %74 = vector.load %arg17[%c0_51, %c0_52] : memref<16x8xf32, #tpu.memory_space<vmem>>, vector<16x8xf32>
    %cst_53 = arith.constant dense<0.000000e+00> : vector<1x8xf32>
    %75 = tpu.matmul %73, %74, %cst_53 {dimension_numbers = #tpu.dot_dimension_numbers<[1], [0], [0], [1], [0, 0, 1, 1], [], []>} : vector<1x16xf32>, vector<16x8xf32>, vector<1x8xf32> -> vector<1x8xf32>
    %c0_54 = arith.constant 0 : index
    %c0_55 = arith.constant 0 : index
    %76 = vector.load %arg19[%c0_54, %c0_55] : memref<8x32xf32, #tpu.memory_space<vmem>>, vector<8x32xf32>
    %cst_56 = arith.constant dense<0.000000e+00> : vector<1x32xf32>
    %77 = tpu.matmul %75, %76, %cst_56 {dimension_numbers = #tpu.dot_dimension_numbers<[1], [0], [0], [1], [0, 0, 1, 1], [], []>} : vector<1x8xf32>, vector<8x32xf32>, vector<1x32xf32> -> vector<1x32xf32>
    %c0_57 = arith.constant 0 : index
    %c0_58 = arith.constant 0 : index
    %78 = vector.load %arg20[%c0_57, %c0_58] : memref<1x32xf32, #tpu.memory_space<vmem>>, vector<1x32xf32>
    %79 = arith.addf %77, %78 : vector<1x32xf32>
    %80 = vector.extract_strided_slice %59 {offsets = [0, 0], sizes = [1, 32], strides = [1, 1]} : vector<8x32xf32> to vector<1x32xf32>
    %c0_59 = arith.constant 0 : index
    %c0_60 = arith.constant 0 : index
    %c0_61 = arith.constant 0 : index
    %81 = vector.load %arg18[%c0_59, %c0_60, %c0_61] : memref<8x32x32xf32, #tpu.memory_space<vmem>>, vector<1x32x32xf32>
    %82 = vector.shape_cast %81 : vector<1x32x32xf32> to vector<32x32xf32>
    %cst_62 = arith.constant dense<0.000000e+00> : vector<1x32xf32>
    %83 = tpu.matmul %80, %82, %cst_62 {dimension_numbers = #tpu.dot_dimension_numbers<[1], [0], [0], [1], [0, 0, 1, 1], [], []>} : vector<1x32xf32>, vector<32x32xf32>, vector<1x32xf32> -> vector<1x32xf32>
    %84 = arith.addf %79, %83 : vector<1x32xf32>
    %85 = vector.extract_strided_slice %59 {offsets = [1, 0], sizes = [1, 32], strides = [1, 1]} : vector<8x32xf32> to vector<1x32xf32>
    %c1 = arith.constant 1 : index
    %c0_63 = arith.constant 0 : index
    %c0_64 = arith.constant 0 : index
    %86 = vector.load %arg18[%c1, %c0_63, %c0_64] : memref<8x32x32xf32, #tpu.memory_space<vmem>>, vector<1x32x32xf32>
    %87 = vector.shape_cast %86 : vector<1x32x32xf32> to vector<32x32xf32>
    %cst_65 = arith.constant dense<0.000000e+00> : vector<1x32xf32>
    %88 = tpu.matmul %85, %87, %cst_65 {dimension_numbers = #tpu.dot_dimension_numbers<[1], [0], [0], [1], [0, 0, 1, 1], [], []>} : vector<1x32xf32>, vector<32x32xf32>, vector<1x32xf32> -> vector<1x32xf32>
    %89 = arith.addf %84, %88 : vector<1x32xf32>
    %90 = vector.extract_strided_slice %59 {offsets = [2, 0], sizes = [1, 32], strides = [1, 1]} : vector<8x32xf32> to vector<1x32xf32>
    %c2 = arith.constant 2 : index
    %c0_66 = arith.constant 0 : index
    %c0_67 = arith.constant 0 : index
    %91 = vector.load %arg18[%c2, %c0_66, %c0_67] : memref<8x32x32xf32, #tpu.memory_space<vmem>>, vector<1x32x32xf32>
    %92 = vector.shape_cast %91 : vector<1x32x32xf32> to vector<32x32xf32>
    %cst_68 = arith.constant dense<0.000000e+00> : vector<1x32xf32>
    %93 = tpu.matmul %90, %92, %cst_68 {dimension_numbers = #tpu.dot_dimension_numbers<[1], [0], [0], [1], [0, 0, 1, 1], [], []>} : vector<1x32xf32>, vector<32x32xf32>, vector<1x32xf32> -> vector<1x32xf32>
    %94 = arith.addf %89, %93 : vector<1x32xf32>
    %95 = vector.extract_strided_slice %59 {offsets = [3, 0], sizes = [1, 32], strides = [1, 1]} : vector<8x32xf32> to vector<1x32xf32>
    %c3 = arith.constant 3 : index
    %c0_69 = arith.constant 0 : index
    %c0_70 = arith.constant 0 : index
    %96 = vector.load %arg18[%c3, %c0_69, %c0_70] : memref<8x32x32xf32, #tpu.memory_space<vmem>>, vector<1x32x32xf32>
    %97 = vector.shape_cast %96 : vector<1x32x32xf32> to vector<32x32xf32>
    %cst_71 = arith.constant dense<0.000000e+00> : vector<1x32xf32>
    %98 = tpu.matmul %95, %97, %cst_71 {dimension_numbers = #tpu.dot_dimension_numbers<[1], [0], [0], [1], [0, 0, 1, 1], [], []>} : vector<1x32xf32>, vector<32x32xf32>, vector<1x32xf32> -> vector<1x32xf32>
    %99 = arith.addf %94, %98 : vector<1x32xf32>
    %100 = vector.extract_strided_slice %59 {offsets = [4, 0], sizes = [1, 32], strides = [1, 1]} : vector<8x32xf32> to vector<1x32xf32>
    %c4 = arith.constant 4 : index
    %c0_72 = arith.constant 0 : index
    %c0_73 = arith.constant 0 : index
    %101 = vector.load %arg18[%c4, %c0_72, %c0_73] : memref<8x32x32xf32, #tpu.memory_space<vmem>>, vector<1x32x32xf32>
    %102 = vector.shape_cast %101 : vector<1x32x32xf32> to vector<32x32xf32>
    %cst_74 = arith.constant dense<0.000000e+00> : vector<1x32xf32>
    %103 = tpu.matmul %100, %102, %cst_74 {dimension_numbers = #tpu.dot_dimension_numbers<[1], [0], [0], [1], [0, 0, 1, 1], [], []>} : vector<1x32xf32>, vector<32x32xf32>, vector<1x32xf32> -> vector<1x32xf32>
    %104 = arith.addf %99, %103 : vector<1x32xf32>
    %105 = vector.extract_strided_slice %59 {offsets = [5, 0], sizes = [1, 32], strides = [1, 1]} : vector<8x32xf32> to vector<1x32xf32>
    %c5 = arith.constant 5 : index
    %c0_75 = arith.constant 0 : index
    %c0_76 = arith.constant 0 : index
    %106 = vector.load %arg18[%c5, %c0_75, %c0_76] : memref<8x32x32xf32, #tpu.memory_space<vmem>>, vector<1x32x32xf32>
    %107 = vector.shape_cast %106 : vector<1x32x32xf32> to vector<32x32xf32>
    %cst_77 = arith.constant dense<0.000000e+00> : vector<1x32xf32>
    %108 = tpu.matmul %105, %107, %cst_77 {dimension_numbers = #tpu.dot_dimension_numbers<[1], [0], [0], [1], [0, 0, 1, 1], [], []>} : vector<1x32xf32>, vector<32x32xf32>, vector<1x32xf32> -> vector<1x32xf32>
    %109 = arith.addf %104, %108 : vector<1x32xf32>
    %110 = vector.extract_strided_slice %59 {offsets = [6, 0], sizes = [1, 32], strides = [1, 1]} : vector<8x32xf32> to vector<1x32xf32>
    %c6 = arith.constant 6 : index
    %c0_78 = arith.constant 0 : index
    %c0_79 = arith.constant 0 : index
    %111 = vector.load %arg18[%c6, %c0_78, %c0_79] : memref<8x32x32xf32, #tpu.memory_space<vmem>>, vector<1x32x32xf32>
    %112 = vector.shape_cast %111 : vector<1x32x32xf32> to vector<32x32xf32>
    %cst_80 = arith.constant dense<0.000000e+00> : vector<1x32xf32>
    %113 = tpu.matmul %110, %112, %cst_80 {dimension_numbers = #tpu.dot_dimension_numbers<[1], [0], [0], [1], [0, 0, 1, 1], [], []>} : vector<1x32xf32>, vector<32x32xf32>, vector<1x32xf32> -> vector<1x32xf32>
    %114 = arith.addf %109, %113 : vector<1x32xf32>
    %115 = vector.extract_strided_slice %59 {offsets = [7, 0], sizes = [1, 32], strides = [1, 1]} : vector<8x32xf32> to vector<1x32xf32>
    %c7 = arith.constant 7 : index
    %c0_81 = arith.constant 0 : index
    %c0_82 = arith.constant 0 : index
    %116 = vector.load %arg18[%c7, %c0_81, %c0_82] : memref<8x32x32xf32, #tpu.memory_space<vmem>>, vector<1x32x32xf32>
    %117 = vector.shape_cast %116 : vector<1x32x32xf32> to vector<32x32xf32>
    %cst_83 = arith.constant dense<0.000000e+00> : vector<1x32xf32>
    %118 = tpu.matmul %115, %117, %cst_83 {dimension_numbers = #tpu.dot_dimension_numbers<[1], [0], [0], [1], [0, 0, 1, 1], [], []>} : vector<1x32xf32>, vector<32x32xf32>, vector<1x32xf32> -> vector<1x32xf32>
    %119 = arith.addf %114, %118 : vector<1x32xf32>
    %cst_84 = arith.constant 0.000000e+00 : f32
    %120 = vector.broadcast %cst_84 : f32 to vector<1x32xf32>
    %121 = arith.maximumf %119, %120 : vector<1x32xf32>
    %122 = arith.mulf %121, %121 : vector<1x32xf32>
    %cst_85 = arith.constant dense<0.000000e+00> : vector<1xf32>
    %123 = vector.multi_reduction <add>, %122, %cst_85 [1] : vector<1x32xf32> to vector<1xf32>
    %124 = vector.shape_cast %123 : vector<1xf32> to vector<1x1xf32>
    %125 = math.sqrt %124 : vector<1x1xf32>
    %cst_86 = arith.constant 9.99999996E-13 : f32
    %126 = vector.broadcast %cst_86 : f32 to vector<1x1xf32>
    %127 = arith.maximumf %125, %126 : vector<1x1xf32>
    %128 = vector.broadcast %127 : vector<1x1xf32> to vector<1x32xf32>
    %129 = arith.divf %121, %128 : vector<1x32xf32>
    %c0_87 = arith.constant 0 : index
    %c0_88 = arith.constant 0 : index
    %130 = vector.load %arg21[%c0_87, %c0_88] : memref<32x6xf32, #tpu.memory_space<vmem>>, vector<32x6xf32>
    %cst_89 = arith.constant dense<0.000000e+00> : vector<1x6xf32>
    %131 = tpu.matmul %129, %130, %cst_89 {dimension_numbers = #tpu.dot_dimension_numbers<[1], [0], [0], [1], [0, 0, 1, 1], [], []>} : vector<1x32xf32>, vector<32x6xf32>, vector<1x6xf32> -> vector<1x6xf32>
    %c0_90 = arith.constant 0 : index
    %c0_91 = arith.constant 0 : index
    %c0_92 = arith.constant 0 : index
    %132 = vector.load %arg22[%c0_90, %c0_91, %c0_92] : memref<1x1x6xf32, #tpu.memory_space<vmem>>, vector<1x1x6xf32>
    %133 = vector.shape_cast %132 : vector<1x1x6xf32> to vector<1x6xf32>
    %134 = vector.shape_cast %131 : vector<1x6xf32> to vector<1x1x6xf32>
    tpu.vector_store %arg22[%c0_90, %c0_91, %c0_92], %134 {strides = array<i32>} : memref<1x1x6xf32, #tpu.memory_space<vmem>>, vector<1x1x6xf32>,
    return
  }
  func.func @transform_0(%arg0: i32) -> (i32, i32, i32) {
    %c0_i32 = arith.constant 0 : i32
    %c0_i32_0 = arith.constant 0 : i32
    %c0_i32_1 = arith.constant 0 : i32
    return %arg0, %c0_i32, %c0_i32_0 : i32, i32, i32
  }
  func.func @transform_1(%arg0: i32) -> (i32, i32, i32) {
    %c0_i32 = arith.constant 0 : i32
    %c0_i32_0 = arith.constant 0 : i32
    %c0_i32_1 = arith.constant 0 : i32
    return %arg0, %c0_i32, %c0_i32_0 : i32, i32, i32
  }
  func.func @transform_2(%arg0: i32) -> (i32, i32, i32) {
    %c0_i32 = arith.constant 0 : i32
    %c0_i32_0 = arith.constant 0 : i32
    %c0_i32_1 = arith.constant 0 : i32
    return %arg0, %c0_i32, %c0_i32_0 : i32, i32, i32
  }
  func.func @transform_3(%arg0: i32) -> (i32, i32) {
    %c0_i32 = arith.constant 0 : i32
    %c0_i32_0 = arith.constant 0 : i32
    %c0_i32_1 = arith.constant 0 : i32
    return %c0_i32, %c0_i32_0 : i32, i32
  }
  func.func @transform_4(%arg0: i32) -> (i32, i32) {
    %c0_i32 = arith.constant 0 : i32
    %c0_i32_0 = arith.constant 0 : i32
    %c0_i32_1 = arith.constant 0 : i32
    return %c0_i32, %c0_i32_0 : i32, i32
  }
  func.func @transform_5(%arg0: i32) -> (i32, i32) {
    %c0_i32 = arith.constant 0 : i32
    %c0_i32_0 = arith.constant 0 : i32
    %c0_i32_1 = arith.constant 0 : i32
    return %c0_i32, %c0_i32_0 : i32, i32
  }
  func.func @transform_6(%arg0: i32) -> (i32, i32) {
    %c0_i32 = arith.constant 0 : i32
    %c0_i32_0 = arith.constant 0 : i32
    %c0_i32_1 = arith.constant 0 : i32
    return %c0_i32, %c0_i32_0 : i32, i32
  }
  func.func @transform_7(%arg0: i32) -> (i32, i32) {
    %c0_i32 = arith.constant 0 : i32
    %c0_i32_0 = arith.constant 0 : i32
    %c0_i32_1 = arith.constant 0 : i32
    return %c0_i32, %c0_i32_0 : i32, i32
  }
  func.func @transform_8(%arg0: i32) -> (i32, i32) {
    %c0_i32 = arith.constant 0 : i32
    %c0_i32_0 = arith.constant 0 : i32
    %c0_i32_1 = arith.constant 0 : i32
    return %c0_i32, %c0_i32_0 : i32, i32
  }
  func.func @transform_9(%arg0: i32) -> (i32, i32) {
    %c0_i32 = arith.constant 0 : i32
    %c0_i32_0 = arith.constant 0 : i32
    %c0_i32_1 = arith.constant 0 : i32
    return %c0_i32, %c0_i32_0 : i32, i32
  }
  func.func @transform_10(%arg0: i32) -> (i32, i32) {
    %c0_i32 = arith.constant 0 : i32
    %c0_i32_0 = arith.constant 0 : i32
    %c0_i32_1 = arith.constant 0 : i32
    return %c0_i32, %c0_i32_0 : i32, i32
  }
  func.func @transform_11(%arg0: i32) -> (i32, i32) {
    %c0_i32 = arith.constant 0 : i32
    %c0_i32_0 = arith.constant 0 : i32
    %c0_i32_1 = arith.constant 0 : i32
    return %c0_i32, %c0_i32_0 : i32, i32
  }
  func.func @transform_12(%arg0: i32) -> (i32, i32) {
    %c0_i32 = arith.constant 0 : i32
    %c0_i32_0 = arith.constant 0 : i32
    %c0_i32_1 = arith.constant 0 : i32
    return %c0_i32, %c0_i32_0 : i32, i32
  }
  func.func @transform_13(%arg0: i32) -> (i32, i32) {
    %c0_i32 = arith.constant 0 : i32
    %c0_i32_0 = arith.constant 0 : i32
    %c0_i32_1 = arith.constant 0 : i32
    return %c0_i32, %c0_i32_0 : i32, i32
  }
  func.func @transform_14(%arg0: i32) -> (i32, i32) {
    %c0_i32 = arith.constant 0 : i32
    %c0_i32_0 = arith.constant 0 : i32
    %c0_i32_1 = arith.constant 0 : i32
    return %c0_i32, %c0_i32_0 : i32, i32
  }
  func.func @transform_15(%arg0: i32) -> (i32, i32) {
    %c0_i32 = arith.constant 0 : i32
    %c0_i32_0 = arith.constant 0 : i32
    %c0_i32_1 = arith.constant 0 : i32
    return %c0_i32, %c0_i32_0 : i32, i32
  }
  func.func @transform_16(%arg0: i32) -> (i32, i32) {
    %c0_i32 = arith.constant 0 : i32
    %c0_i32_0 = arith.constant 0 : i32
    %c0_i32_1 = arith.constant 0 : i32
    return %c0_i32, %c0_i32_0 : i32, i32
  }
  func.func @transform_17(%arg0: i32) -> (i32, i32, i32) {
    %c0_i32 = arith.constant 0 : i32
    %c0_i32_0 = arith.constant 0 : i32
    %c0_i32_1 = arith.constant 0 : i32
    %c0_i32_2 = arith.constant 0 : i32
    return %c0_i32, %c0_i32_0, %c0_i32_1 : i32, i32, i32
  }
  func.func @transform_18(%arg0: i32) -> (i32, i32) {
    %c0_i32 = arith.constant 0 : i32
    %c0_i32_0 = arith.constant 0 : i32
    %c0_i32_1 = arith.constant 0 : i32
    return %c0_i32, %c0_i32_0 : i32, i32
  }
  func.func @transform_19(%arg0: i32) -> (i32, i32) {
    %c0_i32 = arith.constant 0 : i32
    %c0_i32_0 = arith.constant 0 : i32
    %c0_i32_1 = arith.constant 0 : i32
    return %c0_i32, %c0_i32_0 : i32, i32
  }
  func.func @transform_20(%arg0: i32) -> (i32, i32) {
    %c0_i32 = arith.constant 0 : i32
    %c0_i32_0 = arith.constant 0 : i32
    %c0_i32_1 = arith.constant 0 : i32
    return %c0_i32, %c0_i32_0 : i32, i32
  }
  func.func @transform_21(%arg0: i32) -> (i32, i32, i32) {
    %c0_i32 = arith.constant 0 : i32
    %c0_i32_0 = arith.constant 0 : i32
    %c0_i32_1 = arith.constant 0 : i32
    return %arg0, %c0_i32, %c0_i32_0 : i32, i32, i32
  }
  func.func @transform_22(%arg0: i32) -> (i32, i32, i32) {
    %c0_i32 = arith.constant 0 : i32
    %c0_i32_0 = arith.constant 0 : i32
    %c0_i32_1 = arith.constant 0 : i32
    return %arg0, %c0_i32, %c0_i32_0 : i32, i32, i32
  }
}

</mosaic_0001>

<bundles_post_ra>
// kernel: attention_crf_forward.1
= control target key start
LH: loop header
LB: loop body
LE: loop exit
PB: predicated region body
PF: predicated region fallthrough
CT: control target
= control target key end

     0   :  { %s3667_s0 = inlined_call_operand.vmem [shape: f32[4,16,16], index: 0, kind: input, shape index: {}]   ;;  %s3668_s1 = inlined_call_operand.vmem [shape: f32[4,1,64], index: 1, kind: input, shape index: {}]   ;;  %s3669_s2 = inlined_call_operand.vmem [shape: f32[4,1,32], index: 2, kind: input, shape index: {}]   ;;  %s3670_s3 = inlined_call_operand.vmem [shape: f32[16,12], index: 3, kind: input, shape index: {}]   ;;  %s3671_s4 = inlined_call_operand.vmem [shape: f32[1,12], index: 4, kind: input, shape index: {}]   ;;  %s3672_s5 = inlined_call_operand.vmem [shape: f32[12,64], index: 5, kind: input, shape index: {}]   ;;  %s3673_s6 = inlined_call_operand.vmem [shape: f32[32,32], index: 6, kind: input, shape index: {}]   ;;  %s3674_s7 = inlined_call_operand.vmem [shape: f32[1,32], index: 7, kind: input, shape index: {}]   ;;  %s3675_s8 = inlined_call_operand.vmem [shape: f32[32,32], index: 8, kind: input, shape index: {}]   ;;  %s3676_s9 = inlined_call_operand.vmem [shape: f32[1,32], index: 9, kind: input, shape index: {}]   ;;  %s3677_s10 = inlined_call_operand.vmem [shape: f32[32,16], index: 10, kind: input, shape index: {}]   ;;  %s3678_s11 = inlined_call_operand.vmem [shape: f32[1,16], index: 11, kind: input, shape index: {}]   ;;  %s3679_s12 = inlined_call_operand.vmem [shape: f32[16,19], index: 12, kind: input, shape index: {}]   ;;  %s3680_s13 = inlined_call_operand.vmem [shape: f32[1,19], index: 13, kind: input, shape index: {}]   ;;  %s3681_s14 = inlined_call_operand.vmem [shape: f32[32,16], index: 14, kind: input, shape index: {}]   ;;  %s3682_s15 = inlined_call_operand.vmem [shape: f32[1,16], index: 15, kind: input, shape index: {}]   ;;  %s3683_s16 = inlined_call_operand.vmem [shape: f32[16,8], index: 16, kind: input, shape index: {}]   ;;  %s3684_s17 = inlined_call_operand.vmem [shape: f32[8,32,32], index: 17, kind: input, shape index: {}]   ;;  %s3685_s18 = inlined_call_operand.vmem [shape: f32[8,32], index: 18, kind: input, shape index: {}]   ;;  %s3686_s19 = inlined_call_operand.vmem [shape: f32[1,32], index: 19, kind: input, shape index: {}]   ;;  %s3687_s20 = inlined_call_operand.vmem [shape: f32[32,6], index: 20, kind: input, shape index: {}]   ;;  %s3688_s21 = inlined_call_operand.hbm [shape: f32[4,1,6], index: 21, kind: output, shape index: {0}]   ;;  %s3689_s22 = inlined_call_operand.vmem [shape: f32[4,16,11], index: 22, kind: output, shape index: {1}]  }
   0x1   :  { %3704 = sst [smem:[#allocation11_spill]] %s3667_s0 }
   0x2   :  { %3705 = sst [smem:[#allocation12_spill]] %s3668_s1 }
   0x3   :  { %3706 = sst [smem:[#allocation13_spill]] %s3669_s2 }
   0x4   :  { %3707 = sst [smem:[#allocation14_spill]] %s3670_s3 }
   0x5   :  { %3708 = sst [smem:[#allocation15_spill]] %s3671_s4 }
   0x6   :  { %3709 = sst [smem:[#allocation16_spill]] %s3672_s5 }
   0x7   :  { %3710 = sst [smem:[#allocation17_spill]] %s3673_s6 }
   0x8   :  { %28 = vsyncpa [#allocation3], 0 }
   0x9   :  { %30 = vsyncpa [#allocation3 + $0x1], 0  ;;  %s3248_s3 = smov 0   ;;  %s3250_s28 = smov 0  }
   0xa   :  { %s3252_s29 = smov 0   ;;  %s3254_s30 = smov 0  }
   0xb LB: > { %3711 = sst [smem:[#allocation5_spill]] %s3112_s3  ;;  %s3269_s4 = sadd.s32 4294967295, %s3124_s30   ;;  %s3124_s30 = sphi %s3254_s30, %s3731_s30   ;;  %s3120_s29 = sphi %s3252_s29, %s3733_s29   ;;  %s3116_s28 = sphi %s3250_s28, %s3735_s28   ;;  %s3112_s3 = sphi %s3248_s3, %s3734_s3  }
   0xc   : > { %3712 = sst [smem:[#allocation6_spill]] %s3120_s29  ;;  %s2528_s0 = sadd.s32 4294967294, %s3124_s30  }
   0xd   : > { %3713 = sst [smem:[#allocation7_spill]] %s3124_s30  ;;  %s3273_s23 = sadd.s32 1, %s3124_s30  }
   0xe   : > { %3714 = sst [smem:[#allocation8_spill]] %s3273_s23  ;;  %s499_s1 = sadd.s32 1, %s3120_s29 }
   0xf   : > { %s496_s5 = ssub.s32 %s3124_s30, %s3273_s23  ;;  %p509_p0 = scmp.ne.s32.totalorder %s3120_s29, %s3116_s28 }
  0x10   : > { %p497_p1 = scmp.eq.s32.totalorder %s496_s5, 0  ;;  %p510_p2 = scmp.eq.s32.totalorder %s3269_s4, 3 }
  0x11   : > { %p515_p3 = scmp.ne.s32.totalorder %s3116_s28, %s3112_s3  ;;  %p516_p4 = scmp.eq.s32.totalorder %s2528_s0, 3 }
  0x12   : > { %s3284_s24 = scalar_select %p497_p1, %s3120_s29, %s499_s1  }
  0x13   : > { %p3286_p5 = por %p510_p2, %p509_p0  ;;  %p3290_p6 = por %p516_p4, %p515_p3 }
  0x14   : > { %3715 = sst [smem:[#allocation9_spill]] %s3284_s24  ;;  %p2531_p7 = scmp.ge.s32.totalorder %s3124_s30, 1 }
  0x15   : > { %s3717_s25 = scalar_select %p3290_p6, 1, 0 }
  0x16   : > { %p634_p8 = scmp.lt.s32.totalorder %s3124_s30, 5 }
  0x17   : > { %3718 = sst [smem:[#allocation10_spill]] %s3717_s25 }
  0x18   : > { %p635_p9 = pnand %p2531_p7, %p634_p8 }
  0x19   : > { %s3719_s27 = sld [smem:[#allocation14_spill]] (!%p635_p9)  ;;  %p706_p10 = scmp.lt.s32.totalorder (!%p635_p9), %s3269_s4, 3  ;;  %vm733_vm0 = vcmask (!%p635_p9), 130048   ;;  %vm833_vm1 = vcmask (!%p635_p9), 1043456   ;;  %vm3126_vm2 = vmmov (!%p635_p9), 1   ;;  %vm826_vm4 = vcmask (!%p635_p9), 97280  }
  0x1a   : > { %638 = sbr.rel (%p635_p9) target bundleno = 2492 (0x9bc), region = 104  ;;  %s3720_s2 = sld [smem:[#allocation11_spill]] (!%p635_p9)  ;;  %vm2877_vm3 = vmpackc.low (!%p635_p9), %vm833_vm1, %vm3126_vm2  ;;  %vm933_vm5 = vcmask (!%p635_p9), 261120   ;;  %v1017_v30 = vld [vmem:[%s3675_s8] sm:$0xff] (!%p635_p9)  ;;  %v1018_v31 = vld [vmem:[%s3675_s8 + $0x8] sm:$0xff] (!%p635_p9)  ;;  %v3128_v53 = vmov (!%p635_p9), 0.0|0.0  }
  0x1b   : > { %s3722_s26 = sld [smem:[#allocation15_spill]] (!%p635_p9)  ;;  %s3127_s0 = smov (!%p635_p9), 96   ;;  %v2890_v32 = vpack.c.bf16 (!%p635_p9), %v1018_v31, %v1017_v30  ;;  %v1019_v33 = vld [vmem:[%s3675_s8 + $0x10] sm:$0xff] (!%p635_p9)  ;;  %v1020_v34 = vld [vmem:[%s3675_s8 + $0x18] sm:$0xff] (!%p635_p9)  ;;  %v2543_v36 = vld [vmem:[%s3674_s7] ss:$0 sm:$0xff] (!%p635_p9) }
  0x1c   : > { %v2894_v35 = vpack.c.bf16 (!%p635_p9), %v1020_v34, %v1019_v33  ;;  %v1111_v47 = vld [vmem:[%s3677_s10] sm:$0xff] (!%p635_p9)  ;;  %v1112_v48 = vld [vmem:[%s3677_s10 + $0x8] sm:$0xff] (!%p635_p9)  ;;  %v1113_v50 = vld [vmem:[%s3677_s10 + $0x10] sm:$0xff] (!%p635_p9)  ;;  %vm3129_vm6 = vmmov (!%p635_p9), 0   ;;  %vm1518_vm7 = vcmask (!%p635_p9), 122880   ;;  %vm1303_vm10 = vcmask (!%p635_p9), 89088  }
  0x1d   : > { %v2898_v49 = vpack.c.bf16 (!%p635_p9), %v1112_v48, %v1111_v47  ;;  %v1114_v51 = vld [vmem:[%s3677_s10 + $0x18] sm:$0xff] (!%p635_p9)  ;;  %v2546_v54 = vld [vmem:[%s3676_s9] ss:$0 sm:$0xff] (!%p635_p9)  ;;  %v1440_v60 = vld [vmem:[%s3681_s14 + $0x8] sm:$0xff] (!%p635_p9)  ;;  %vm1609_vm11 = vcmask (!%p635_p9), 64512   ;;  %vm2316_vm12 = vcmask (!%p635_p9), 253952  }
  0x1e   : > { %v2902_v52 = vpack.c.bf16 (!%p635_p9), %v1114_v51, %v1113_v50  ;;  %v1439_v59 = vld [vmem:[%s3681_s14] sm:$0xff] (!%p635_p9)  ;;  %v1206_v34 = vld [vmem:[%s3679_s12 + $0x8] sm:$0xff] (!%p635_p9)  ;;  %vm2407_vm15 = vcmask (!%p635_p9), 40960  }
  0x1f   : > { %v724_v0 = vld [vmem:[%s3719_s27] sm:$0xff] (!%p635_p9)  ;;  %v725_v1 = vld [vmem:[%s3719_s27 + $0x8] sm:$0xff] (!%p635_p9)  ;;  %s3721_s27 = sld [smem:[#allocation16_spill]] (!%p635_p9)  ;;  %v2914_v62 = vpack.c.bf16 (!%p635_p9), %v1440_v60, %v1439_v59  ;;  %v1686_v59 = vld [vmem:[%s3684_s17 + $0x18] sm:$0xff] (!%p635_p9) }
  0x20   : > { %v2872_v2 = vpack.c.bf16 (!%p635_p9), %v725_v1, %v724_v0  ;;  %v1441_v1 = vld [vmem:[%s3681_s14 + $0x10] sm:$0xff] (!%p635_p9)  ;;  %v1205_v33 = vld [vmem:[%s3679_s12] sm:$0xff] (!%p635_p9) }
  0x21   : > { %s3304_s5 = scalar_select %p706_p10, %s3269_s4, 3  ;;  %v2536_v8 = vld [vmem:[%s3722_s26] ss:$0 sm:$0xff] }
  0x22   : > { %2873 = vmatprep.subr.bf16.mxu0 %v2872_v2 }
  0x23   : > { %2875 = vmatpush3.bf16.msra.mxu0 %v2872_v2  ;;  %s3699_s24 = sshll.u32 %s3304_s5, 4  ;;  %v1442_v2 = vld [vmem:[%s3681_s14 + $0x18] sm:$0xff] }
  0x24   : > { %s710_s23 = scalar_lea.vmem %s3720_s2, %s3699_s24  ;;  %s3723_s2 = sld [smem:[#allocation17_spill]] }
  0x25   : > { %v722_v3 = vld [vmem:[%s710_s23] sm:$0xff]  ;;  %v723_v4 = vld [vmem:[%s710_s23 + $0x8] sm:$0xff]  ;;  %s3725_s24 = sld [smem:[#allocation13_spill]]  ;;  %s3726_s23 = sshll.u32 %s3304_s5, 4 }
  0x26   : > { %2693 = vmatprep.mubr.msk.f32.mxu0 %vm733_vm0, %v722_v3  ;;  %v817_v5 = vld [vmem:[%s3721_s27] sm:$0xff]  ;;  %v818_v6 = vld [vmem:[%s3721_s27 + $0x8] sm:$0xf]  ;;  %s3724_s27 = sld [smem:[#allocation12_spill]]  ;;  %s3460_s25 = scalar_lea.vmem %s3689_s22, %s3726_s23 }
  0x27   : > { %2694 = vmatmul.mubr.msk.f32.vlgmr.msra.gmra.mrb[0].mxu0 %vm733_vm0, %v723_v4  ;;  %v2876_v7 = vpack.c.bf16 %v818_v6, %v817_v5  ;;  %v2917_v5 = vpack.c.bf16 %v1442_v2, %v1441_v1  ;;  %v3130_v6 = vmov 0.0  }
  0x29   : > { %2878 = vmatprep.subr.msk.bf16.mxu0 %vm2877_vm3, %v2876_v7 }
  0x2a   : > { %2881 = vmatpush3.bf16.msk.msra.mxu0 %vm2877_vm3, %v2876_v7  ;;  %v916_v15 = vld [vmem:[%s3723_s2] sm:$0xff]  ;;  %v917_v16 = vld [vmem:[%s3723_s2 + $0x8] sm:$0xff]  ;;  %v918_v18 = vld [vmem:[%s3723_s2 + $0x10] sm:$0xff] }
  0x2b   : > { %v2882_v17 = vpack.c.bf16 %v917_v16, %v916_v15  ;;  %v919_v19 = vld [vmem:[%s3723_s2 + $0x18] sm:$0xff]  ;;  %s716_s1 = scalar_lea.vmem %s3725_s24, %s3304_s5  ;;  %s3702_s24 = smov 120  }
  0x2c   : > { %v2886_v20 = vpack.c.bf16 %v919_v19, %v918_v18  ;;  %s713_s30 = scalar_lea.vmem %s3724_s27, %s3304_s5  ;;  %s3727_s2 = smov 120  }
  0x2d   : > { %2883 = vmatprep.subr.bf16.mxu0 %v2882_v17  ;;  %v2539_v21 = vld [vmem:[%s713_s30] ss:$0 sm:$0xff]  ;;  %s2596_s27 = sshll.u32 %s3269_s4, 4  ;;  %s3132_s4 = smov [#allocation2]  }
  0x2e   : > { %s3625_s23 = scalar_lea.hbm %s3688_s21, %s2596_s27 }
  0xfa   : > { %v2695_v9 = vpop.f32.mrb[0].mxu0 }
  0xfb   : > { %v812_v10 = vadd.f32 %v2695_v9, %v2536_v8  ;;  %v806_v11 = vpop.f32.mrb[1].mxu0  ;;  %v1438_v9 = vld [vmem:[%s716_s1] sm:$0x1] }
  0xfc   : > { %v807_v12 = vadd.f32 %v2536_v8, %v806_v11 }
  0xfd   : > { %v816_v14 = vmax.f32 %v812_v10, 0.0 }
  0xfe   : > { %v815_v13 = vmax.f32 %v807_v12, 0.0 }
 0x100   : > { %2700 = vmatprep.mubr.msk.f32.mxu0 %vm826_vm4, %v815_v13 }
 0x101   : > { %2701 = vmatmul.mubr.msk.f32.vlgmr.msra.gmra.mrb[2].mxu0 %vm826_vm4, %v816_v14 }
 0x102   : > { %2885 = vmatpush3.bf16.msra.mxu0 %v2882_v17 }
 0x103   : > { %2887 = vmatprep.subr.bf16.mxu0 %v2886_v20 }
 0x106   : > { %2889 = vmatpush3.bf16.msra.mxu0 %v2886_v20 }
 0x107   : > { %2891 = vmatprep.subr.bf16.mxu0 %v2890_v32 }
 0x1d4   : > { %v2702_v22 = vpop.f32.mrb[2].mxu0 }
 0x1d5   : > { %v903_v23 = vpop.f32.mrb[3].mxu0  ;;  %v909_v25 = vadd.f32 %v2702_v22, %v2539_v21 }
 0x1d6   : > { %v904_v24 = vadd.f32 %v2539_v21, %v903_v23 }
 0x1d7   : > { %v915_v27 = vmax.f32 %v909_v25, 0.0  ;;  %3036 = vtanh.f32 %v909_v25 }
 0x1d8   : > { %v914_v26 = vmax.f32 %v904_v24, 0.0  ;;  %3038 = vtanh.f32 %v904_v24 }
 0x1da   : > { %929 = vrot.lane.b32.xlu0 %v914_v26, %s3127_s0 }
 0x1de   : > { %931 = vrot.lane.b32.xlu0 %v915_v27, %s3127_s0  ;;  %s3066_s0 = sshll.u32 %s3132_s4, 4  ;;  %s3067_s0 = int_to_ptr.vmem [resolvable:$false] %s3066_s0 }
 0x1df   : > { %s3068_s1 = scalar_lea.vmem %s3067_s0, 32 }
 0x1e1   : > { %v3037_v42 = vpop.eup %3036 }
 0x1e2   : > { %v3039_v44 = vpop.eup %3038 }
 0x24c   : > { %v930_v28 = vpop.permute.xlu0 %929 }
 0x24d   : > { %2711 = vmatprep.mubr.msk.f32.mxu0 %vm933_vm5, %v930_v28 }
 0x250   : > { %v932_v29 = vpop.permute.xlu0 %931 }
 0x251   : > { %2712 = vmatmul.mubr.msk.f32.vlgmr.msra.gmra.mrb[4].mxu0 %vm933_vm5, %v932_v29 }
 0x252   : > { %2893 = vmatpush3.bf16.msra.mxu0 %v2890_v32 }
 0x253   : > { %2895 = vmatprep.subr.bf16.mxu0 %v2894_v35 }
 0x256   : > { %2897 = vmatpush3.bf16.msra.mxu0 %v2894_v35  ;;  %v2906_v35 = vpack.c.bf16 %v1206_v34, %v1205_v33  ;;  %v2572_v34 = vld [vmem:[%s3684_s17 + $0x70] sm:$0xff] }
 0x257   : > { %2899 = vmatprep.subr.bf16.mxu0 %v2898_v49 }
 0x258   : > { %2907 = vmatprep.subr.bf16.mxu1 %v2906_v35 }
 0x259   : > { %2909 = vmatpush3.bf16.msra.mxu1 %v2906_v35  ;;  %v2573_v35 = vld [vmem:[%s3684_s17 + $0x78] sm:$0xff] }
 0x25a   : > { %2910 = vmatprep.subr.bf16.mxu1 %v3128_v53 }
 0x324   : > { %v2713_v37 = vpop.f32.mrb[4].mxu0 }
 0x325   : > { %v1010_v38 = vadd.f32 %v2713_v37, %v2543_v36  ;;  %v1004_v39 = vpop.f32.mrb[5].mxu0 }
 0x326   : > { %v1005_v40 = vadd.f32 %v2543_v36, %v1004_v39  ;;  %v2549_v36 = vld [vmem:[%s3678_s11] ss:$0 sm:$0xff] }
 0x327   : > { %v1014_v41 = vmax.f32 %v1010_v38, 0.0 }
 0x328   : > { %v1013_v43 = vmax.f32 %v1005_v40, 0.0 }
 0x329   : > { %v1016_v45 = vadd.f32 %v3037_v42, %v1014_v41  ;;  %v1443_v41 = vld [vmem:[%s3682_s15] sm:$0x1] }
 0x32a   : > { %v1015_v46 = vadd.f32 %v3039_v44, %v1013_v43 }
 0x32c   : > { %2722 = vmatprep.mubr.msk.f32.mxu0 %vm933_vm5, %v1015_v46 }
 0x32d   : > { %2723 = vmatmul.mubr.msk.f32.vlgmr.msra.gmra.mrb[6].mxu0 %vm933_vm5, %v1016_v45 }
 0x32e   : > { %2901 = vmatpush3.bf16.msra.mxu0 %v2898_v49  ;;  %v2552_v49 = vld [vmem:[%s3680_s13] ss:$0 sm:$0xff] }
 0x32f   : > { %2903 = vmatprep.subr.bf16.mxu0 %v2902_v52 }
 0x332   : > { %2905 = vmatpush3.bf16.msra.mxu0 %v2902_v52 }
 0x333   : > { %2913 = vmatprep.subr.bf16.mxu0 %v3128_v53 }
 0x400   : > { %v2724_v55 = vpop.f32.mrb[6].mxu0 }
 0x401   : > { %v1106_v56 = vadd.f32 %v2724_v55, %v2546_v54  ;;  %v1100_v57 = vpop.f32.mrb[7].mxu0  ;;  %v1683_v55 = vld [vmem:[%s3684_s17] sm:$0xff] }
 0x402   : > { %v1101_v58 = vadd.f32 %v2546_v54, %v1100_v57  ;;  %v1685_v57 = vld [vmem:[%s3684_s17 + $0x10] sm:$0xff] }
 0x403   : > { %3040 = vtanh.f32 %v1106_v56  ;;  %v1684_v56 = vld [vmem:[%s3684_s17 + $0x8] sm:$0xff]  ;;  %v2926_v60 = vpack.c.bf16 %v1686_v59, %v1685_v57  ;;  %v2587_v57 = vld [vmem:[%s3684_s17 + $0xd0] sm:$0xff] }
 0x404   : > { %3042 = vtanh.f32 %v1101_v58  ;;  %v2923_v58 = vpack.c.bf16 %v1684_v56, %v1683_v55 }
 0x40d   : > { %v3041_v61 = vpop.eup %3040 }
 0x40e   : > { %v3043_v63 = vpop.eup %3042  ;;  %v1307_v0 = vsel %vm933_vm5, %v3041_v61, -inf }
 0x40f   : > { %v1306_v3 = vsel %vm933_vm5, %v3043_v63, -inf  ;;  %2733 = vmatprep.mubr.msk.f32.mxu0 %vm933_vm5, %v3043_v63 }
 0x410   : > { %v1308_v4 = vmax.f32 %v1306_v3, %v1307_v0  ;;  %2734 = vmatmul.mubr.msk.f32.vlgmr.msra.gmra.mrb[8].mxu0 %vm933_vm5, %v3041_v61 }
 0x411   : > { %2915 = vmatpush3.bf16.msra.mxu0 %v2914_v62  ;;  %2758 = vmatprep.mubr.msk.f32.mxu0 %vm3129_vm6, %v3130_v6 }
 0x412   : > { %v1309_v7 = vrot.slane %v1308_v4, 4  ;;  %2916 = vmatprep.subr.bf16.mxu0 %v3128_v53 }
 0x414   : > { %v1310_v8 = vmax.f32 %v1308_v4, %v1309_v7  ;;  %v1532_v4 = vld [vmem:[%s3683_s16] sm:$0xff] }
 0x415   : > { %2918 = vmatpush3.bf16.msra.mxu0 %v2917_v5  ;;  %v1533_v5 = vld [vmem:[%s3683_s16 + $0x8] sm:$0xff] }
 0x416   : > { %v1311_v10 = vrot.slane %v1310_v8, 2  ;;  %2922 = vmatprep.subr.bf16.mxu0 %v3128_v53  ;;  %v2920_v7 = vpack.c.bf16 %v1533_v5, %v1532_v4  ;;  %v1608_v4 = vld [vmem:[%s3686_s19] sm:$0x1] }
 0x418   : > { %2759 = vmatmul.mubr.msk.f32.vlgmr.msra.gmra.mrb[10].mxu0 %vm933_vm5, %v1438_v9  ;;  %v1312_v11 = vmax.f32 %v1310_v8, %v1311_v10 }
 0x419   : > { %2781 = vmatprep.mubr.msk.f32.mxu0 %vm3129_vm6, %v3130_v6  ;;  %2924 = vmatpush3.bf16.msra.mxu0 %v2923_v58  ;;  %v2588_v58 = vld [vmem:[%s3684_s17 + $0xd8] sm:$0xff] }
 0x41a   : > { %v1313_v12 = vrot.slane %v1312_v11, 1  ;;  %2925 = vmatprep.subr.bf16.mxu0 %v3128_v53  ;;  %v2962_v59 = vpack.c.bf16 %v2588_v58, %v2587_v57 }
 0x41c   : > { %v1314_v13 = vmax.f32 %v1312_v11, %v1313_v12  ;;  %v1607_v12 = vld [vmem:[%s3685_s18] sm:$0xff] }
 0x41d   : > { %2927 = vmatpush3.bf16.msra.mxu0 %v2926_v60  ;;  %v2590_v60 = vld [vmem:[%s3684_s17 + $0xe0] sm:$0xff] }
 0x41e   : > { %v1315_v14 = vsub.f32 %v3043_v63, %v1314_v13  ;;  %v1316_v15 = vsub.f32 %v3041_v61, %v1314_v13  ;;  %2928 = vmatprep.subr.bf16.mxu0 %v3128_v53  ;;  %v2560_v13 = vld [vmem:[%s3684_s17 + $0x20] sm:$0xff] }
 0x420   : > { %v1317_v16 = vmul.f32 1.442695, %v1315_v14  ;;  %v1319_v17 = vmul.f32 1.442695, %v1316_v15  ;;  %v2561_v14 = vld [vmem:[%s3684_s17 + $0x28] sm:$0xff] }
 0x421   : > { %v2929_v15 = vpack.c.bf16 %v2561_v14, %v2560_v13 }
 0x422   : > { %3044 = vpow2.f32 %v1317_v16  ;;  %v2565_v16 = vld [vmem:[%s3684_s17 + $0x40] sm:$0xff] }
 0x423   : > { %3046 = vpow2.f32 %v1319_v17  ;;  %v2566_v17 = vld [vmem:[%s3684_s17 + $0x48] sm:$0xff] }
 0x42c   : > { %v3045_v18 = vpop.eup %3044 }
 0x42d   : > { %v3047_v19 = vpop.eup %3046  ;;  %v1321_v20 = vsel %vm933_vm5, %v3045_v18, 0.0 }
 0x42e   : > { %v1322_v21 = vsel %vm933_vm5, %v3047_v19, 0.0 }
 0x42f   : > { %v1323_v22 = vadd.f32 %v1322_v21, %v1321_v20 }
 0x431   : > { %v1324_v23 = vrot.slane %v1323_v22, 4 }
 0x433   : > { %v1325_v24 = vadd.f32 %v1324_v23, %v1323_v22  ;;  %v2935_v22 = vpack.c.bf16 %v2566_v17, %v2565_v16  ;;  %v2330_v17 = vld [vmem:[%s3687_s20] sm:$0xff] }
 0x435   : > { %v1326_v25 = vrot.slane %v1325_v24, 2 }
 0x437   : > { %v1327_v26 = vadd.f32 %v1326_v25, %v1325_v24  ;;  %v2567_v24 = vld [vmem:[%s3684_s17 + $0x50] sm:$0xff]  ;;  %v2568_v25 = vld [vmem:[%s3684_s17 + $0x58] sm:$0xff] }
 0x439   : > { %v1328_v27 = vrot.slane %v1327_v26, 1 }
 0x43b   : > { %v1329_v28 = vadd.f32 %v1328_v27, %v1327_v26 }
 0x43d   : > { %3048 = vrcp.f32 %v1329_v28  ;;  %v2938_v28 = vpack.c.bf16 %v2568_v25, %v2567_v24 }
 0x447   : > { %v3049_v29 = vpop.eup %3048 }
 0x448   : > { %v1331_v30 = vmul.f32 %v3049_v29, %v3045_v18  ;;  %v1332_v31 = vmul.f32 %v3049_v29, %v3047_v19  ;;  %v2562_v18 = vld [vmem:[%s3684_s17 + $0x30] sm:$0xff]  ;;  %v2563_v19 = vld [vmem:[%s3684_s17 + $0x38] sm:$0xff] }
 0x449   : > { %v2932_v23 = vpack.c.bf16 %v2563_v19, %v2562_v18  ;;  %v2331_v18 = vld [vmem:[%s3687_s20 + $0x8] sm:$0xff]  ;;  %v2332_v19 = vld [vmem:[%s3687_s20 + $0x10] sm:$0xff] }
 0x44a   : > { %v2911_v32 = vpack.c.bf16 %v1332_v31, %v1331_v30  ;;  %v2570_v30 = vld [vmem:[%s3684_s17 + $0x60] sm:$0xff]  ;;  %v2571_v31 = vld [vmem:[%s3684_s17 + $0x68] sm:$0xff] }
 0x4e3   : > { %v2735_v37 = vpop.f32.mrb[8].mxu0 }
 0x4e4   : > { %v1200_v38 = vadd.f32 %v2735_v37, %v2549_v36  ;;  %v1194_v39 = vpop.f32.mrb[9].mxu0  ;;  %v2575_v37 = vld [vmem:[%s3684_s17 + $0x80] sm:$0xff] }
 0x4e5   : > { %v1195_v40 = vadd.f32 %v2549_v36, %v1194_v39  ;;  %v2944_v36 = vpack.c.bf16 %v2573_v35, %v2572_v34 }
 0x4e7   : > { %3050 = vtanh.f32 %v1195_v40 }
 0x4e8   : > { %3052 = vtanh.f32 %v1200_v38  ;;  %v2576_v38 = vld [vmem:[%s3684_s17 + $0x88] sm:$0xff] }
 0x4e9   : > { %v2947_v39 = vpack.c.bf16 %v2576_v38, %v2575_v37 }
 0x4eb   : > { %v1513_v42 = vpop.f32.mrb[10].mxu0 }
 0x4ec   : > { %v1514_v43 = vadd.f32 %v1513_v42, %v1443_v41  ;;  %v2760_v44 = vpop.f32.mrb[11].mxu0  ;;  %v2577_v41 = vld [vmem:[%s3684_s17 + $0x90] sm:$0xff]  ;;  %v2578_v42 = vld [vmem:[%s3684_s17 + $0x98] sm:$0xff] }
 0x4ed   : > { %v2580_v44 = vld [vmem:[%s3684_s17 + $0xa0] sm:$0xff] }
 0x4ee   : > { %v1517_v45 = vmul.f32 %v1514_v43, %v1514_v43 }
 0x4f0   : > { %v1519_v46 = vsel %vm1518_vm7, %v1517_v45, 0.0  ;;  %v2581_v45 = vld [vmem:[%s3684_s17 + $0xa8] sm:$0xff] }
 0x4f1   : > { %v3051_v47 = vpop.eup %3050  ;;  %1520 = vadd.xlane.f32.xlu1 %v1519_v46  ;;  %v2953_v46 = vpack.c.bf16 %v2581_v45, %v2580_v44 }
 0x4f2   : > { %v3053_v48 = vpop.eup %3052  ;;  %2740 = vmatprep.mubr.msk.f32.mxu1 %vm733_vm0, %v3051_v47 }
 0x4f3   : > { %2741 = vmatmul.mubr.msk.f32.vlgmr.msra.gmra.mrb[0].mxu1 %vm733_vm0, %v3053_v48  ;;  %v2582_v48 = vld [vmem:[%s3684_s17 + $0xb0] sm:$0xff] }
 0x4f4   : > { %2912 = vmatpush3.bf16.msra.mxu1 %v2911_v32  ;;  %2747 = vmatprep.mubr.msk.f32.mxu1 %vm3129_vm6, %v3130_v6  ;;  %v2941_v32 = vpack.c.bf16 %v2571_v31, %v2570_v30 }
 0x4f5   : > { %2919 = vmatprep.subr.bf16.mxu1 %v3128_v53 }
 0x57e   : > { %v1521_v61 = vpop.xlane.xlu1 %1520 }
 0x57f   : > { %3054 = vrsqrt.f32 %v1521_v61  ;;  %vm1524_vm8 = vcmp.eq.f32.partialorder %v1521_v61, inf  ;;  %v1527_v0 = vand.u32 2147483648, %v1521_v61  ;;  %vm1526_vm9 = vcmp.eq.f32.partialorder %v1521_v61, 0.0 }
 0x589   : > { %v3055_v62 = vpop.eup %3054 }
 0x58a   : > { %v1523_v63 = vmul.f32 %v3055_v62, %v1521_v61 }
 0x58c   : > { %v1525_v1 = vsel %vm1524_vm8, %v1521_v61, %v1523_v63  ;;  %v2591_v61 = vld [vmem:[%s3684_s17 + $0xe8] sm:$0xff] }
 0x58d   : > { %v1528_v2 = vsel %vm1526_vm9, %v1527_v0, %v1525_v1  ;;  %v2965_v62 = vpack.c.bf16 %v2591_v61, %v2590_v60  ;;  %v2592_v0 = vld [vmem:[%s3684_s17 + $0xf0] sm:$0xff]  ;;  %v2593_v1 = vld [vmem:[%s3684_s17 + $0xf8] sm:$0xff] }
 0x58e   : > { %v1529_v3 = vmax.f32 %v1528_v2, 1e-12  ;;  %v2968_v2 = vpack.c.bf16 %v2593_v1, %v2592_v0 }
 0x590   : > { %3056 = vrcp.f32 %v1529_v3 }
 0x59a   : > { %v3057_v8 = vpop.eup %3056 }
 0x59b   : > { %v1531_v10 = vmul.f32 %v3057_v8, %v1514_v43  ;;  %v2950_v43 = vpack.c.bf16 %v2578_v42, %v2577_v41 }
 0x5c6   : > { %v2742_v50 = vpop.f32.mrb[0].mxu1 }
 0x5c7   : > { %v1286_v51 = vpop.f32.mrb[1].mxu1  ;;  %v1292_v54 = vadd.f32 %v2742_v50, %v2552_v49 }
 0x5c8   : > { %v3424_v52 = vadd.f32 %v2552_v49, %v1286_v51  ;;  %v2583_v49 = vld [vmem:[%s3684_s17 + $0xb8] sm:$0xff]  ;;  %v2585_v51 = vld [vmem:[%s3684_s17 + $0xc0] sm:$0xff] }
 0x5c9   : > { %v2956_v50 = vpack.c.bf16 %v2583_v49, %v2582_v48 }
 0x5ca   : > { %1333 = vxpose.xlu1.b32.start [1/2] (short) (narrow) %v3424_v52, 8 }
 0x5ce   : > { %1334 = vxpose.xlu1.b32.end [2/2] (short) (narrow) %v1292_v54, 8 }
 0x5ec   : > { %1299 = vrot.lane.b32.xlu1 %v1292_v54, %s3702_s24  ;;  %v2586_v54 = vld [vmem:[%s3684_s17 + $0xc8] sm:$0xff]  ;;  %s697_s24 = sand.u32 1, %s3116_s28  }
 0x5ed   : > { %v2959_v55 = vpack.c.bf16 %v2586_v54, %v2585_v51  ;;  %s2410_s26 = scalar_lea.sflag [#allocation3], %s697_s24 }
 0x64a   : > { %v1349_v9 = vpop.trf.xlu1 }
 0x64b   : > { %2748 = vmatmul.mubr.msk.f32.vlgmr.msra.gmra.mrb[2].mxu1 %vm733_vm0, %v1349_v9 }
 0x64c   : > { %2921 = vmatpush3.bf16.msra.mxu1 %v2920_v7  ;;  %2765 = vmatprep.mubr.msk.f32.mxu1 %vm3129_vm6, %v3130_v6 }
 0x64d   : > { %2768 = vmatprep.subr.mxu1 %v3130_v6 }
 0x64f   : > { %2766 = vmatmul.mubr.msk.f32.vlgmr.msra.gmra.mrb[4].mxu1 %vm733_vm0, %v1531_v10 }
 0x650   : > { %2770 = vmatprep.mubr.msk.f32.mxu1 %vm3129_vm6, %v3130_v6  ;;  %2769 = vmatpush3.msra.mxu1 %v1607_v12 }
 0x651   : > { %2934 = vmatprep.subr.bf16.mxu1 %v3128_v53 }
 0x65e   : > { %v1300_v11 = vpop.permute.xlu1 %1299 }
 0x65f   : > { %1305 = vst.msk [vmem:[%s3460_s25 + $0x8] sm:$0xff] %vm1303_vm10, %v1300_v11 }
 0x71e   : > { %v3486_v20 = vpop.f32.mrb[2].mxu1 }
 0x71f   : > { %v2749_v21 = vpop.f32.mrb[3].mxu1  ;;  %2782 = vmatmul.mubr.msk.f32.vlgmr.msra.gmra.mrb[12].mxu0 %vm933_vm5, %v3486_v20  ;;  %v1766_v29 = vrot.slane %v3486_v20, 1  ;;  %v1845_v33 = vrot.slane %v3486_v20, 2  ;;  %v1924_v40 = vrot.slane %v3486_v20, 3  ;;  %v2003_v47 = vrot.slane %v3486_v20, 4 }
 0x720   : > { %2930 = vmatpush3.bf16.msra.mxu0 %v2929_v15  ;;  %2792 = vmatprep.mubr.msk.f32.mxu0 %vm3129_vm6, %v3130_v6  ;;  %v2082_v56 = vrot.slane %v3486_v20, 5  ;;  %v2161_v63 = vrot.slane %v3486_v20, 6  ;;  %v2240_v3 = vrot.slane %v3486_v20, 7  ;;  %v2971_v20 = vpack.c.bf16 %v2331_v18, %v2330_v17  ;;  %v2333_v21 = vld [vmem:[%s3687_s20 + $0x18] sm:$0xff] }
 0x721   : > { %2931 = vmatprep.subr.bf16.mxu0 %v3128_v53 }
 0x722   : > { %v1603_v26 = vpop.f32.mrb[4].mxu1 }
 0x723   : > { %v2767_v27 = vpop.f32.mrb[5].mxu1  ;;  %2771 = vmatmul.mubr.msk.f32.vlgmr.msra.gmra.mrb[6].mxu1 %vm1609_vm11, %v1603_v26 }
 0x724   : > { %2936 = vmatpush3.bf16.msra.mxu1 %v2935_v22  ;;  %2933 = vmatpush3.bf16.msra.mxu0 %v2932_v23  ;;  %v2974_v22 = vpack.c.bf16 %v2333_v21, %v2332_v19 }
 0x725   : > { %2937 = vmatprep.subr.bf16.mxu1 %v3128_v53  ;;  %2803 = vmatprep.mubr.msk.f32.mxu1 %vm3129_vm6, %v3130_v6 }
 0x726   : > { %2970 = vmatprep.subr.bf16.mxu0 %v3128_v53 }
 0x727   : > { %2793 = vmatmul.mubr.msk.f32.vlgmr.msra.gmra.mrb[12].mxu0 %vm933_vm5, %v1766_v29 }
 0x728   : > { %2939 = vmatpush3.bf16.msra.mxu1 %v2938_v28  ;;  %2869 = vmatprep.mubr.msk.f32.mxu0 %vm3129_vm6, %v3130_v6 }
 0x729   : > { %2940 = vmatprep.subr.bf16.mxu1 %v3128_v53  ;;  %2972 = vmatpush3.bf16.msra.mxu0 %v2971_v20 }
 0x72a   : > { %2973 = vmatprep.subr.bf16.mxu0 %v3128_v53 }
 0x72b   : > { %2804 = vmatmul.mubr.msk.f32.vlgmr.msra.gmra.mrb[8].mxu1 %vm933_vm5, %v1845_v33 }
 0x72c   : > { %2942 = vmatpush3.bf16.msra.mxu1 %v2941_v32  ;;  %2814 = vmatprep.mubr.msk.f32.mxu1 %vm3129_vm6, %v3130_v6 }
 0x72d   : > { %2943 = vmatprep.subr.bf16.mxu1 %v3128_v53  ;;  %2975 = vmatpush3.bf16.msra.mxu0 %v2974_v22 }
 0x730   : > { %2945 = vmatpush3.bf16.msra.mxu1 %v2944_v36 }
 0x731   : > { %2946 = vmatprep.subr.bf16.mxu1 %v3128_v53 }
 0x733   : > { %2815 = vmatmul.mubr.msk.f32.vlgmr.msra.gmra.mrb[8].mxu1 %vm933_vm5, %v1924_v40 }
 0x734   : > { %2948 = vmatpush3.bf16.msra.mxu1 %v2947_v39  ;;  %2825 = vmatprep.mubr.msk.f32.mxu1 %vm3129_vm6, %v3130_v6 }
 0x735   : > { %2949 = vmatprep.subr.bf16.mxu1 %v3128_v53 }
 0x738   : > { %2951 = vmatpush3.bf16.msra.mxu1 %v2950_v43 }
 0x739   : > { %2952 = vmatprep.subr.bf16.mxu1 %v3128_v53 }
 0x73b   : > { %2826 = vmatmul.mubr.msk.f32.vlgmr.msra.gmra.mrb[8].mxu1 %vm933_vm5, %v2003_v47 }
 0x73c   : > { %2954 = vmatpush3.bf16.msra.mxu1 %v2953_v46  ;;  %2836 = vmatprep.mubr.msk.f32.mxu1 %vm3129_vm6, %v3130_v6 }
 0x73d   : > { %2955 = vmatprep.subr.bf16.mxu1 %v3128_v53 }
 0x740   : > { %2957 = vmatpush3.bf16.msra.mxu1 %v2956_v50 }
 0x741   : > { %2958 = vmatprep.subr.bf16.mxu1 %v3128_v53 }
 0x743   : > { %2837 = vmatmul.mubr.msk.f32.vlgmr.msra.gmra.mrb[8].mxu1 %vm933_vm5, %v2082_v56 }
 0x744   : > { %2960 = vmatpush3.bf16.msra.mxu1 %v2959_v55  ;;  %2847 = vmatprep.mubr.msk.f32.mxu1 %vm3129_vm6, %v3130_v6 }
 0x745   : > { %2961 = vmatprep.subr.bf16.mxu1 %v3128_v53 }
 0x748   : > { %2963 = vmatpush3.bf16.msra.mxu1 %v2962_v59 }
 0x749   : > { %2964 = vmatprep.subr.bf16.mxu1 %v3128_v53 }
 0x74b   : > { %2848 = vmatmul.mubr.msk.f32.vlgmr.msra.gmra.mrb[8].mxu1 %vm933_vm5, %v2161_v63 }
 0x74c   : > { %2966 = vmatpush3.bf16.msra.mxu1 %v2965_v62  ;;  %2858 = vmatprep.mubr.msk.f32.mxu1 %vm3129_vm6, %v3130_v6 }
 0x74d   : > { %2967 = vmatprep.subr.bf16.mxu1 %v3128_v53 }
 0x750   : > { %2969 = vmatpush3.bf16.msra.mxu1 %v2968_v2 }
 0x753   : > { %2859 = vmatmul.mubr.msk.f32.vlgmr.msra.gmra.mrb[8].mxu1 %vm933_vm5, %v2240_v3 }
 0x7f6   : > { %v1679_v5 = vpop.f32.mrb[6].mxu1 }
 0x7f7   : > { %v2772_v7 = vpop.f32.mrb[7].mxu1  ;;  %v1680_v8 = vadd.f32 %v1679_v5, %v1608_v4 }
 0x7fa   : > { %v1835_v9 = vpop.f32.mrb[12].mxu0 }
 0x7fb   : > { %v2977_v10 = vadd.f32 %v1835_v9, %v1680_v8  ;;  %v2794_v11 = vpop.f32.mrb[13].mxu0 }
 0x826   : > { %v2309_v12 = vpop.f32.mrb[8].mxu1 }
 0x827   : > { %v2978_v13 = vadd.f32 %v2977_v10, %v2309_v12  ;;  %v2860_v6 = vpop.f32.mrb[9].mxu1 }
 0x829   : > { %v2314_v14 = vmax.f32 %v2978_v13, 0.0 }
 0x82b   : > { %v2315_v15 = vmul.f32 %v2314_v14, %v2314_v14 }
 0x82d   : > { %v2317_v16 = vsel %vm2316_vm12, %v2315_v15, 0.0 }
 0x82e   : > { %2318 = vadd.xlane.f32.xlu0 %v2317_v16 }
 0x844   : > { %1297 = vrot.lane.b32.xlu0 %v3424_v52, %s3727_s2  ;;  %s698_s2 = scalar_lea.vmem [#allocation2], %s697_s24 }
 0x845   : > { %s2427_s5 = sshll.u32 %s698_s2, 4  ;;  %s3627_s5 = int_to_ptr.vmem [resolvable:$true] %s2427_s5 }
 0x846   : > { %s3062_s3 = scalar_lea.vmem %s3627_s5, 16  ;;  %p3069_p0 = scmp.lt.s32.totalorder %s3627_s5, %s3067_s0 }
 0x847   : > { %p3063_p11 = scmp.ne.s32.totalorder %s3627_s5, %s3062_s3  ;;  %p3070_p1 = scmp.lt.s32.totalorder %s3068_s1, %s3062_s3 }
 0x849   : > { %p3064_p12 = pnand %p3063_p11, %p3286_p5  ;;  %p3071_p2 = por %p3070_p1, %p3069_p0 }
 0x84b   : > { %p3065_p13 = pneg %p3064_p12 }
 0x84d   : > { %p3072_p3 = pnand %p3071_p2, %p3065_p13 }
 0x8bb   : > { %v2319_v52 = vpop.xlane.xlu0 %2318 }
 0x8bc   : > { %3058 = vrsqrt.f32 %v2319_v52  ;;  %vm2322_vm13 = vcmp.eq.f32.partialorder %v2319_v52, inf  ;;  %v2325_v26 = vand.u32 2147483648, %v2319_v52  ;;  %vm2324_vm14 = vcmp.eq.f32.partialorder %v2319_v52, 0.0 }
 0x8bf   : > { %v1298_v23 = vpop.permute.xlu0 %1297 }
 0x8c0   : > { %1304 = vst.msk [vmem:[%s3460_s25] sm:$0xff] %vm1303_vm10, %v1298_v23 }
 0x8c6   : > { %v3059_v24 = vpop.eup %3058 }
 0x8c7   : > { %v2321_v25 = vmul.f32 %v3059_v24, %v2319_v52 }
 0x8c9   : > { %v2323_v27 = vsel %vm2322_vm13, %v2319_v52, %v2321_v25 }
 0x8ca   : > { %v2326_v28 = vsel %vm2324_vm14, %v2325_v26, %v2323_v27 }
 0x8cb   : > { %v2327_v29 = vmax.f32 %v2326_v28, 1e-12 }
 0x8cd   : > { %3060 = vrcp.f32 %v2327_v29 }
 0x8d7   : > { %v3061_v30 = vpop.eup %3060 }
 0x8d8   : > { %v2329_v53 = vmul.f32 %v3061_v30, %v2314_v14 }
 0x8da   : > { %2870 = vmatmul.mubr.msk.f32.vlgmr.msra.gmra.mrb[14].mxu0 %vm933_vm5, %v2329_v53 }
 0x9ad   : > { %v2403_v31 = vpop.f32.mrb[14].mxu0 }
 0x9ae   : > { %2408 = vst.msk [vmem:[%s698_s2] sm:$0x1] %vm2407_vm15, %v2403_v31  ;;  %v2871_v32 = vpop.f32.mrb[15].mxu0 }
 0x9af   : > { %3075 = shalt.err (!%p3072_p3)
}
 0x9b0   : > { %s3076_s30 = scalar_lea.hbm %s3625_s23, 16  ;;  %s3080_s2 = scalar_lea.hbm %s3688_s21, 64 }
 0x9b1   : > { %p3077_p4 = scmp.ne.s32.totalorder %s3625_s23, %s3076_s30  ;;  %p3081_p9 = scmp.lt.u32.totalorder %s3625_s23, %s3688_s21 }
 0x9b2   : > { %p3082_p10 = scmp.lt.u32.totalorder %s3080_s2, %s3076_s30  ;;  %p3084_p12 = scmp.lt.u32.totalorder %s3076_s30, %s3625_s23 }
 0x9b3   : > { %p3078_p7 = pnand %p3077_p4, %p3286_p5 }
 0x9b4   : > { %p3083_p11 = por %p3082_p10, %p3081_p9 }
 0x9b5   : > { %p3079_p8 = pneg %p3078_p7 }
 0x9b6   : > { %p3085_p13 = por %p3084_p12, %p3083_p11 }
 0x9b8   : > { %p3086_p0 = pnand %p3085_p13, %p3079_p8 }
 0x9ba   : > { %3089 = shalt.err (!%p3086_p0)
}
 0x9bb   : > { %2991 = dma.vmem_to_hbm [thread:$0]  (%p3286_p5), %s3627_s5, 16, %s3625_s23, %s2410_s26  }
 0x9bc PF: > { %s3728_s3 = sld [smem:[#allocation7_spill]]  ;;  %s3729_s4 = sld [smem:[#allocation5_spill]] }
 0x9c2   : > { %p2997_p1 = scmp.ge.s32.totalorder %s3728_s3, 2  ;;  %s2442_s1 = sand.u32 1, %s3729_s4  }
 0x9c3   : > { %s2443_s24 = scalar_lea.sflag [#allocation3], %s2442_s1 }
 0x9c4   : > { %p2994_p2 = pnand %p2997_p1, %p3290_p6 }
 0x9c6   : > { %3107 = dma.done.wait (!%p2994_p2), %s2443_s24, 16  }
 0x9c7   : > { %3109 = vsyncadd (!%p2994_p2), %s2443_s24, 4294967280  ;;  %s3731_s30 = sld [smem:[#allocation8_spill]]  ;;  %s3732_s27 = sld [smem:[#allocation6_spill]] }
 0x9c8   : > { %s3733_s29 = sld [smem:[#allocation9_spill]]  ;;  %s3734_s3 = smov %s3116_s28 }
 0x9cd   : > { %p33_p3 = scmp.ge.s32.totalorder %s3731_s30, 6   ;;  %s3735_s28 = smov %s3732_s27 }
 0x9cf   :  { %35 = sbr.rel (!%p33_p3) target bundleno = 11 (0xb), region = 164 }
 0x9d6   :  { %2455 = vsyncpa [#allocation3], 1 }
 0x9d7   :  { %2457 = vsyncpa [#allocation3 + $0x1], 1 }

</bundles_post_ra>
